<compile_context>
chip_gen: v7x
topology: tpu7x:2x2x1
jax: 0.10.0
libtpu: 0.0.40
codegen_flags: <defaults>
</compile_context>

<pallas_src>
import functools

import jax
import jax.numpy as jnp
from jax import lax
from jax.experimental import pallas as pl
from jax.experimental.pallas import tpu as pltpu

_SUBLANE = 8
_BN_EPS = 1e-5
_TM_CAP = 4096


def _vmem_budgets():
    """Generation-aware VMEM budgets: 128 MiB parts (v5e/v6e) get a large
    working set; 64 MiB-per-TC parts (v7x) stay conservative."""
    budget, limit = 20 << 20, 48 << 20            # safe fallback
    try:
        info_fn = getattr(pltpu, "get_tpu_info", None)
        if info_fn is not None:
            cap = getattr(info_fn(), "vmem_capacity_bytes", None)
            if cap:
                if cap >= (96 << 20):             # v5e / v6e
                    budget, limit = 48 << 20, 96 << 20
                else:                             # v7x
                    budget, limit = 20 << 20, 40 << 20
    except Exception:
        pass
    return budget, limit


_VMEM_BUDGET, _VMEM_LIMIT = _vmem_budgets()


def _round_up(x, m):
    return ((x + m - 1) // m) * m


def _choose_tile_m(M, bytes_per_row, fixed_bytes=0):
    """Pick an M tile (multiple of 8) whose double-buffered working set fits
    the budget.  Prefer an exact divisor of M so no row padding / re-slicing
    is ever needed; otherwise rebalance so the last tile is mostly full."""
    bytes_per_row = max(int(bytes_per_row), 1)
    avail = max(_VMEM_BUDGET - fixed_bytes, _SUBLANE * bytes_per_row)
    tm_max = (avail // bytes_per_row) // _SUBLANE * _SUBLANE
    tm_max = max(_SUBLANE, min(tm_max, _TM_CAP, _round_up(M, _SUBLANE)))
    if M % _SUBLANE == 0:
        tm = tm_max
        while tm >= _SUBLANE:
            if M % tm == 0:
                return tm
            tm -= _SUBLANE
    grid_m = max(1, -(-M // tm_max))
    return _round_up(-(-M // grid_m), _SUBLANE)


# ----------------------------------------------------------------------------
# Kernel 1: bf16 im2col matmul on the MXU (f32 accumulation).
#   emit_stats: also emit per-M-tile per-channel sum / sum-of-squares (f32)
#               for training-mode BatchNorm, in the same pass.
#   otherwise:  fuse the activation epilogue (enc1 relu, dec3 tanh).
#   Output stored bf16 (stats are reduced in f32 before the cast).
# ----------------------------------------------------------------------------
def _matmul_kernel(x_ref, w_ref, *out_refs, act, emit_stats):
    y = jnp.dot(x_ref[...], w_ref[...], preferred_element_type=jnp.float32)
    if emit_stats:
        y_ref, sum_ref, sq_ref = out_refs
        sum_ref[0] = jnp.sum(y, axis=0, keepdims=True)
        sq_ref[0] = jnp.sum(y * y, axis=0, keepdims=True)
    else:
        (y_ref,) = out_refs
        if act == "relu":
            y = jnp.maximum(y, 0.0)
        elif act == "tanh":
            y = jnp.tanh(y)
    y_ref[...] = y.astype(y_ref.dtype)


def _matmul_pallas(x_cols, w2d, act, emit_stats):
    """x_cols: (M, K) ; w2d: (K, C). Returns bf16 (M, C) [+ f32 (C,) stats]."""
    M, K = x_cols.shape
    C = w2d.shape[1]

    x_cols = x_cols.astype(jnp.bfloat16)
    w2d = w2d.astype(jnp.bfloat16)

    # double-buffered lhs + out (bf16) + f32 dot / stats temporaries per row
    bytes_per_row = 2 * K * 2 + 2 * C * 2 + (3 if emit_stats else 2) * C * 4
    fixed = 2 * K * C * 2 + (1 << 20)            # resident weight (dbuf) + slack
    tm = _choose_tile_m(M, bytes_per_row, fixed)
    Mp = _round_up(M, tm)
    if Mp != M:
        x_cols = jnp.pad(x_cols, ((0, Mp - M), (0, 0)))   # zero rows: stats exact
    grid_m = Mp // tm

    in_specs = [
        pl.BlockSpec((tm, K), lambda i: (i, 0)),   # M tile of im2col matrix
        pl.BlockSpec((K, C), lambda i: (0, 0)),    # full weight, VMEM-resident
    ]
    out_shapes = [jax.ShapeDtypeStruct((Mp, C), jnp.bfloat16)]
    out_specs = [pl.BlockSpec((tm, C), lambda i: (i, 0))]
    if emit_stats:
        out_shapes += [jax.ShapeDtypeStruct((grid_m, 1, C), jnp.float32)] * 2
        out_specs += [pl.BlockSpec((1, 1, C), lambda i: (i, 0, 0))] * 2

    flops = 2 * Mp * K * C
    transcendentals = Mp * C if (act == "tanh" and not emit_stats) else 0
    bytes_accessed = Mp * K * 2 + K * C * 2 + Mp * C * 2

    out = pl.pallas_call(
        functools.partial(_matmul_kernel, act=act, emit_stats=emit_stats),
        out_shape=tuple(out_shapes) if emit_stats else out_shapes[0],
        grid=(grid_m,),
        in_specs=in_specs,
        out_specs=tuple(out_specs) if emit_stats else out_specs[0],
        compiler_params=pltpu.CompilerParams(
            dimension_semantics=("parallel",),
            vmem_limit_bytes=_VMEM_LIMIT,
        ),
        cost_estimate=pl.CostEstimate(
            flops=flops, transcendentals=transcendentals,
            bytes_accessed=bytes_accessed),
    )(x_cols, w2d)

    if emit_stats:
        y, s, ss = out
        y = y[:M] if Mp != M else y
        return y, jnp.sum(s[:, 0, :], axis=0), jnp.sum(ss[:, 0, :], axis=0)
    return out[:M] if Mp != M else out


# ----------------------------------------------------------------------------
# Kernel 2: residual-block finalize.
#   out = (y2 * scale2 + shift2) + affine(residual)   [no trailing activation]
#   The residual may itself be a raw conv output with a pending BN+ReLU
#   (block 0 gets enc3's raw output), applied in-kernel for free.
# ----------------------------------------------------------------------------
def _bn_res_kernel(y_ref, sc_ref, sh_ref, r_ref, rsc_ref, rsh_ref, o_ref, *,
                   res_relu):
    y = y_ref[...].astype(jnp.float32) * sc_ref[...] + sh_ref[...]
    r = r_ref[...].astype(jnp.float32) * rsc_ref[...] + rsh_ref[...]
    if res_relu:
        r = jnp.maximum(r, 0.0)
    o_ref[...] = (y + r).astype(o_ref.dtype)


def _bn_res_pallas(y, scale, shift, res, res_scale, res_shift, res_relu):
    M, C = y.shape
    bytes_per_row = 2 * 3 * C * 2 + 2 * C * 4
    tm = _choose_tile_m(M, bytes_per_row)
    Mp = _round_up(M, tm)
    if Mp != M:
        y = jnp.pad(y, ((0, Mp - M), (0, 0)))
        res = jnp.pad(res, ((0, Mp - M), (0, 0)))
    grid_m = Mp // tm

    row_spec = pl.BlockSpec((tm, C), lambda i: (i, 0))
    ch_spec = pl.BlockSpec((1, C), lambda i: (0, 0))

    out = pl.pallas_call(
        functools.partial(_bn_res_kernel, res_relu=res_relu),
        out_shape=jax.ShapeDtypeStruct((Mp, C), jnp.bfloat16),
        grid=(grid_m,),
        in_specs=[row_spec, ch_spec, ch_spec, row_spec, ch_spec, ch_spec],
        out_specs=row_spec,
        compiler_params=pltpu.CompilerParams(
            dimension_semantics=("parallel",),
            vmem_limit_bytes=_VMEM_LIMIT,
        ),
        cost_estimate=pl.CostEstimate(
            flops=6 * Mp * C, transcendentals=0,
            bytes_accessed=3 * Mp * C * 2),
    )(y.astype(jnp.bfloat16),
      scale.reshape(1, C).astype(jnp.float32),
      shift.reshape(1, C).astype(jnp.float32),
      res.astype(jnp.bfloat16),
      res_scale.reshape(1, C).astype(jnp.float32),
      res_shift.reshape(1, C).astype(jnp.float32))
    return out[:M] if Mp != M else out


# ----------------------------------------------------------------------------
# Plain-JAX glue: producer-affine fold, im2col gather, BN finalize.
# ----------------------------------------------------------------------------
def _apply_affine(x_nhwc, affine):
    """Apply a pending per-channel BN (+ReLU) from the producing layer.  This
    is an elementwise op that XLA fuses into the pad/gather building the cols
    matrix, so the activation is never a separate HBM round trip."""
    if affine is None:
        return x_nhwc.astype(jnp.bfloat16)
    scale, shift, relu = affine
    y = x_nhwc.astype(jnp.float32) * scale + shift
    if relu:
        y = jnp.maximum(y, 0.0)
    return y.astype(jnp.bfloat16)


def _im2col(x_nhwc, kh, kw, stride, pad):
    if pad:
        x_nhwc = jnp.pad(x_nhwc, ((0, 0), (pad, pad), (pad, pad), (0, 0)))
    N, H, W, C = x_nhwc.shape
    Ho = (H - kh) // stride + 1
    Wo = (W - kw) // stride + 1
    patches = [x_nhwc[:, i:i + Ho * stride:stride, j:j + Wo * stride:stride, :]
               for i in range(kh) for j in range(kw)]
    cols = jnp.stack(patches, axis=3)                 # (N, Ho, Wo, kh*kw, C)
    return cols.reshape(N * Ho * Wo, kh * kw * C), (N, Ho, Wo)


def _bn_scale_shift(sums, sumsqs, count, gamma, beta):
    """Training-mode BN finalize: y_norm*g + b == y*scale + shift."""
    mean = sums / count
    var = jnp.maximum(sumsqs / count - mean * mean, 0.0)
    scale = gamma.astype(jnp.float32) * lax.rsqrt(var + _BN_EPS)
    shift = beta.astype(jnp.float32) - mean * scale
    return scale, shift


# ----------------------------------------------------------------------------
# Layer wrappers.
# ----------------------------------------------------------------------------
def conv_layer(x_nhwc, affine_in, w, gamma=None, beta=None, *, stride, pad,
               use_bn, act="none"):
    """Conv2d(bias=False) over affine_in(x_nhwc).
    use_bn=True : returns (raw bf16 NHWC output, scale, shift) -- the BN+ReLU
                  is folded into whichever op consumes it next.
    use_bn=False: returns (activated bf16 NHWC output, None, None)."""
    kh, kw, cin, cout = w.shape
    a = _apply_affine(x_nhwc, affine_in)
    cols, (N, Ho, Wo) = _im2col(a, kh, kw, stride, pad)
    M = N * Ho * Wo
    w2d = w.reshape(kh * kw * cin, cout)

    if not use_bn:
        y = _matmul_pallas(cols, w2d, act=act, emit_stats=False)
        return y.reshape(N, Ho, Wo, cout), None, None

    y, s, ss = _matmul_pallas(cols, w2d, act="none", emit_stats=True)
    scale, shift = _bn_scale_shift(s, ss, M, gamma, beta)
    return y.reshape(N, Ho, Wo, cout), scale, shift


def residual_block(x_nhwc, x_affine, params, r):
    """out = affine(x) + BN(conv3x3(ReLU(BN(conv3x3(affine(x)))))).
    conv1's BN+ReLU is folded into conv2's gather; conv2's BN and the residual
    add run in the fused _bn_res_pallas finalize kernel."""
    y1, s1, t1 = conv_layer(x_nhwc, x_affine,
                            params[f"res{r}_w1"], params[f"res{r}_g1"],
                            params[f"res{r}_b1"], stride=1, pad=1, use_bn=True)
    y2, s2, t2 = conv_layer(y1, (s1, t1, True),
                            params[f"res{r}_w2"], params[f"res{r}_g2"],
                            params[f"res{r}_b2"], stride=1, pad=1, use_bn=True)
    N, H, W, C = y2.shape
    M = N * H * W
    if x_affine is None:
        rs = jnp.ones((C,), jnp.float32)
        rt = jnp.zeros((C,), jnp.float32)
        rrelu = False
    else:
        rs, rt, rrelu = x_affine
    out = _bn_res_pallas(y2.reshape(M, C), s2, t2,
                         x_nhwc.reshape(M, C), rs, rt, rrelu)
    return out.reshape(N, H, W, C)


def conv_transpose_layer(x_nhwc, affine_in, w, gamma=None, beta=None, *,
                         use_bn, act="none"):
    """ConvTranspose2d(k=4, s=2, p=1, bias=False) as ONE fused matmul: a
    single 3x3/stride-1 im2col of the 1-padded input against a (9*cin, 4*cout)
    weight with each parity's 2x2 sub-conv embedded (zeros elsewhere), then a
    parity interleave.  Fills the 256-wide MXU on v6e/v7x and cuts im2col
    traffic 16x->9x per input channel (on v5e the 4-sub-conv form would avoid
    the 2.25x zero-FLOP padding; not branched here).
    `w` is in equivalent-conv layout (kh, kw, cin, cout)."""
    kh, kw, cin, cout = w.shape          # kh == kw == 4
    N, H, W, _ = x_nhwc.shape
    a = _apply_affine(x_nhwc, affine_in)
    cols, _ = _im2col(a, 3, 3, 1, 1)     # (M, 9*cin), M = N*H*W
    M = N * H * W

    # Combined weight: parity p=2r+s gets w[r+2u, s+2v] at 3x3 tap (r+u, s+v).
    wc = jnp.zeros((3, 3, cin, 4 * cout), w.dtype)
    for r in range(2):
        for s in range(2):
            p_idx = 2 * r + s
            for u in range(2):
                for v in range(2):
                    wc = wc.at[r + u, s + v, :,
                               p_idx * cout:(p_idx + 1) * cout].set(
                                   w[r + 2 * u, s + 2 * v])
    w2d = wc.reshape(9 * cin, 4 * cout)

    if use_bn:
        y, ssum, ssq = _matmul_pallas(cols, w2d, act="none", emit_stats=True)
        scale, shift = _bn_scale_shift(ssum.reshape(4, cout).sum(axis=0),
                                       ssq.reshape(4, cout).sum(axis=0),
                                       4 * M, gamma, beta)
    else:
        y = _matmul_pallas(cols, w2d, act=act, emit_stats=False)
        scale = shift = None

    # Parity interleave: y[m, (2r+s)*cout + c] -> out[n, 2a+r, 2b+s, c].
    # TODO(synk): replace with an in-kernel strided out_spec scatter.
    out = (y.reshape(N, H, W, 2, 2, cout)
            .transpose(0, 1, 3, 2, 4, 5)
            .reshape(N, 2 * H, 2 * W, cout))
    return out, scale, shift


# ----------------------------------------------------------------------------
# Generator: parameters + forward.
# ----------------------------------------------------------------------------
def init_generator_params(key, conv_dim, n_res_block):
    ks = iter(jax.random.split(key, 6 + 2 * n_res_block))

    def w(kh, kw, cin, cout):
        return jax.random.normal(next(ks), (kh, kw, cin, cout), jnp.float32) * 0.05

    def bn(c):
        return jnp.ones((c,), jnp.float32), jnp.zeros((c,), jnp.float32)

    cd = conv_dim
    p = {}
    p["enc1_w"] = w(4, 4, 3, cd)
    p["enc2_w"] = w(4, 4, cd, 2 * cd);       p["enc2_g"], p["enc2_b"] = bn(2 * cd)
    p["enc3_w"] = w(4, 4, 2 * cd, 4 * cd);   p["enc3_g"], p["enc3_b"] = bn(4 * cd)
    for r in range(n_res_block):
        p[f"res{r}_w1"] = w(3, 3, 4 * cd, 4 * cd)
        p[f"res{r}_g1"], p[f"res{r}_b1"] = bn(4 * cd)
        p[f"res{r}_w2"] = w(3, 3, 4 * cd, 4 * cd)
        p[f"res{r}_g2"], p[f"res{r}_b2"] = bn(4 * cd)
    p["dec1_w"] = w(4, 4, 4 * cd, 2 * cd);   p["dec1_g"], p["dec1_b"] = bn(2 * cd)
    p["dec2_w"] = w(4, 4, 2 * cd, cd);       p["dec2_g"], p["dec2_b"] = bn(cd)
    p["dec3_w"] = w(4, 4, cd, 3)
    return p


def generator_forward(x_nchw, params, conv_dim, n_res_block):
    x = jnp.transpose(x_nchw, (0, 2, 3, 1))                       # NCHW -> NHWC

    # Encoder. enc1 has no BN (ReLU fused in the matmul epilogue); enc2/enc3
    # emit raw output + (scale, shift) that the next consumer folds in.
    a1, _, _ = conv_layer(x, None, params["enc1_w"],
                          stride=2, pad=1, use_bn=False, act="relu")
    y2, s2, t2 = conv_layer(a1, None, params["enc2_w"],
                            params["enc2_g"], params["enc2_b"],
                            stride=2, pad=1, use_bn=True)
    y3, s3, t3 = conv_layer(y2, (s2, t2, True), params["enc3_w"],
                            params["enc3_g"], params["enc3_b"],
                            stride=2, pad=1, use_bn=True)

    # Residual blocks: out = x + BN(conv3x3(ReLU(BN(conv3x3(x))))).
    h, h_aff = y3, (s3, t3, True)
    for r in range(n_res_block):
        h = residual_block(h, h_aff, params, r)
        h_aff = None

    # Decoder.  dec1/dec2 BN+ReLU fold into the next layer's gather; dec3 has
    # tanh fused in the matmul epilogue.
    yd1, sd1, td1 = conv_transpose_layer(h, None, params["dec1_w"],
                                         params["dec1_g"], params["dec1_b"],
                                         use_bn=True)
    yd2, sd2, td2 = conv_transpose_layer(yd1, (sd1, td1, True), params["dec2_w"],
                                         params["dec2_g"], params["dec2_b"],
                                         use_bn=True)
    out, _, _ = conv_transpose_layer(yd2, (sd2, td2, True), params["dec3_w"],
                                     use_bn=False, act="tanh")

    return jnp.transpose(out.astype(jnp.float32), (0, 3, 1, 2))   # NHWC -> NCHW


if __name__ == "__main__":
    CONV_DIM = 8       # small stand-in for the default 64
    N_RES = 2          # small stand-in for the default 6
    key = jax.random.PRNGKey(0)
    k_x, k_p = jax.random.split(key)

    x = jax.random.normal(k_x, (2, 3, 16, 16), jnp.float32)   # NCHW, like PyTorch
    params = init_generator_params(k_p, CONV_DIM, N_RES)

    fwd = jax.jit(functools.partial(generator_forward,
                                    conv_dim=CONV_DIM, n_res_block=N_RES))
    out = jax.block_until_ready(fwd(x, params))

    assert out.shape == (2, 3, 16, 16), out.shape
    assert bool(jnp.all(jnp.isfinite(out)))
    assert bool(jnp.all(jnp.abs(out) <= 1.0 + 1e-6))   # tanh output range
    print("KERNEL_OK")
</pallas_src>

<mosaic_0001>
module attributes {stable_mosaic.version = 11 : i64} {
  func.func @_matmul_kernel(%arg0: i32, %arg1: memref<128x48xbf16, #tpu.memory_space<vmem>>, %arg2: memref<48x8xbf16, #tpu.memory_space<vmem>>, %arg3: memref<128x8xbf16, #tpu.memory_space<vmem>>) attributes {dimension_semantics = [#tpu.dimension_semantics<parallel>], iteration_bounds = array<i64: 1>, scalar_prefetch = 0 : i64, scratch_operands = 0 : i64, tpu.core_type = #tpu.core_type<tc>, window_params = [{transform_indices = @transform_0, window_bounds = array<i64: 128, 48>}, {pipeline_mode = #tpu.pipeline_mode<synchronous>, transform_indices = @transform_1, window_bounds = array<i64: 48, 8>}, {transform_indices = @transform_2, window_bounds = array<i64: 128, 8>}]} {
    %c0 = arith.constant 0 : index
    %c0_0 = arith.constant 0 : index
    %0 = vector.load %arg1[%c0, %c0_0] : memref<128x48xbf16, #tpu.memory_space<vmem>>, vector<128x48xbf16>
    %c0_1 = arith.constant 0 : index
    %c0_2 = arith.constant 0 : index
    %1 = vector.load %arg2[%c0_1, %c0_2] : memref<48x8xbf16, #tpu.memory_space<vmem>>, vector<48x8xbf16>
    %cst = arith.constant dense<0.000000e+00> : vector<128x8xf32>
    %2 = tpu.matmul %0, %1, %cst {dimension_numbers = #tpu.dot_dimension_numbers<[1], [0], [0], [1], [0, 0, 1, 1], [], []>} : vector<128x48xbf16>, vector<48x8xbf16>, vector<128x8xf32> -> vector<128x8xf32>
    %cst_3 = arith.constant 0.000000e+00 : f32
    %3 = vector.broadcast %cst_3 : f32 to vector<128x8xf32>
    %4 = arith.maximumf %2, %3 : vector<128x8xf32>
    %5 = arith.truncf %4 : vector<128x8xf32> to vector<128x8xbf16>
    %c0_4 = arith.constant 0 : index
    %c0_5 = arith.constant 0 : index
    %6 = vector.load %arg3[%c0_4, %c0_5] : memref<128x8xbf16, #tpu.memory_space<vmem>>, vector<128x8xbf16>
    tpu.vector_store %arg3[%c0_4, %c0_5], %5 {strides = array<i32>} : memref<128x8xbf16, #tpu.memory_space<vmem>>, vector<128x8xbf16>,
    return
  }
  func.func @transform_0(%arg0: i32) -> (i32, i32) {
    %c0_i32 = arith.constant 0 : i32
    %c0_i32_0 = arith.constant 0 : i32
    return %arg0, %c0_i32 : i32, i32
  }
  func.func @transform_1(%arg0: i32) -> (i32, i32) {
    %c0_i32 = arith.constant 0 : i32
    %c0_i32_0 = arith.constant 0 : i32
    %c0_i32_1 = arith.constant 0 : i32
    return %c0_i32, %c0_i32_0 : i32, i32
  }
  func.func @transform_2(%arg0: i32) -> (i32, i32) {
    %c0_i32 = arith.constant 0 : i32
    %c0_i32_0 = arith.constant 0 : i32
    return %arg0, %c0_i32 : i32, i32
  }
}

module attributes {stable_mosaic.version = 11 : i64} {
  func.func @_matmul_kernel(%arg0: i32, %arg1: memref<32x128xbf16, #tpu.memory_space<vmem>>, %arg2: memref<128x16xbf16, #tpu.memory_space<vmem>>, %arg3: memref<32x16xbf16, #tpu.memory_space<vmem>>, %arg4: memref<1x1x16xf32, #tpu.memory_space<vmem>>, %arg5: memref<1x1x16xf32, #tpu.memory_space<vmem>>) attributes {dimension_semantics = [#tpu.dimension_semantics<parallel>], iteration_bounds = array<i64: 1>, scalar_prefetch = 0 : i64, scratch_operands = 0 : i64, tpu.core_type = #tpu.core_type<tc>, window_params = [{transform_indices = @transform_0, window_bounds = array<i64: 32, 128>}, {pipeline_mode = #tpu.pipeline_mode<synchronous>, transform_indices = @transform_1, window_bounds = array<i64: 128, 16>}, {transform_indices = @transform_2, window_bounds = array<i64: 32, 16>}, {transform_indices = @transform_3, window_bounds = array<i64: 1, 1, 16>}, {transform_indices = @transform_4, window_bounds = array<i64: 1, 1, 16>}]} {
    %c0 = arith.constant 0 : index
    %c0_0 = arith.constant 0 : index
    %0 = vector.load %arg1[%c0, %c0_0] : memref<32x128xbf16, #tpu.memory_space<vmem>>, vector<32x128xbf16>
    %c0_1 = arith.constant 0 : index
    %c0_2 = arith.constant 0 : index
    %1 = vector.load %arg2[%c0_1, %c0_2] : memref<128x16xbf16, #tpu.memory_space<vmem>>, vector<128x16xbf16>
    %cst = arith.constant dense<0.000000e+00> : vector<32x16xf32>
    %2 = tpu.matmul %0, %1, %cst {dimension_numbers = #tpu.dot_dimension_numbers<[1], [0], [0], [1], [0, 0, 1, 1], [], []>} : vector<32x128xbf16>, vector<128x16xbf16>, vector<32x16xf32> -> vector<32x16xf32>
    %cst_3 = arith.constant dense<0.000000e+00> : vector<16xf32>
    %3 = vector.multi_reduction <add>, %2, %cst_3 [0] : vector<32x16xf32> to vector<16xf32>
    %4 = vector.shape_cast %3 : vector<16xf32> to vector<1x16xf32>
    %c0_4 = arith.constant 0 : index
    %c0_5 = arith.constant 0 : index
    %c0_6 = arith.constant 0 : index
    %5 = vector.load %arg4[%c0_4, %c0_5, %c0_6] : memref<1x1x16xf32, #tpu.memory_space<vmem>>, vector<1x1x16xf32>
    %6 = vector.shape_cast %5 : vector<1x1x16xf32> to vector<1x16xf32>
    %7 = vector.shape_cast %4 : vector<1x16xf32> to vector<1x1x16xf32>
    tpu.vector_store %arg4[%c0_4, %c0_5, %c0_6], %7 {strides = array<i32>} : memref<1x1x16xf32, #tpu.memory_space<vmem>>, vector<1x1x16xf32>,
    %8 = arith.mulf %2, %2 : vector<32x16xf32>
    %cst_7 = arith.constant dense<0.000000e+00> : vector<16xf32>
    %9 = vector.multi_reduction <add>, %8, %cst_7 [0] : vector<32x16xf32> to vector<16xf32>
    %10 = vector.shape_cast %9 : vector<16xf32> to vector<1x16xf32>
    %c0_8 = arith.constant 0 : index
    %c0_9 = arith.constant 0 : index
    %c0_10 = arith.constant 0 : index
    %11 = vector.load %arg5[%c0_8, %c0_9, %c0_10] : memref<1x1x16xf32, #tpu.memory_space<vmem>>, vector<1x1x16xf32>
    %12 = vector.shape_cast %11 : vector<1x1x16xf32> to vector<1x16xf32>
    %13 = vector.shape_cast %10 : vector<1x16xf32> to vector<1x1x16xf32>
    tpu.vector_store %arg5[%c0_8, %c0_9, %c0_10], %13 {strides = array<i32>} : memref<1x1x16xf32, #tpu.memory_space<vmem>>, vector<1x1x16xf32>,
    %14 = arith.truncf %2 : vector<32x16xf32> to vector<32x16xbf16>
    %c0_11 = arith.constant 0 : index
    %c0_12 = arith.constant 0 : index
    %15 = vector.load %arg3[%c0_11, %c0_12] : memref<32x16xbf16, #tpu.memory_space<vmem>>, vector<32x16xbf16>
    tpu.vector_store %arg3[%c0_11, %c0_12], %14 {strides = array<i32>} : memref<32x16xbf16, #tpu.memory_space<vmem>>, vector<32x16xbf16>,
    return
  }
  func.func @transform_0(%arg0: i32) -> (i32, i32) {
    %c0_i32 = arith.constant 0 : i32
    %c0_i32_0 = arith.constant 0 : i32
    return %arg0, %c0_i32 : i32, i32
  }
  func.func @transform_1(%arg0: i32) -> (i32, i32) {
    %c0_i32 = arith.constant 0 : i32
    %c0_i32_0 = arith.constant 0 : i32
    %c0_i32_1 = arith.constant 0 : i32
    return %c0_i32, %c0_i32_0 : i32, i32
  }
  func.func @transform_2(%arg0: i32) -> (i32, i32) {
    %c0_i32 = arith.constant 0 : i32
    %c0_i32_0 = arith.constant 0 : i32
    return %arg0, %c0_i32 : i32, i32
  }
  func.func @transform_3(%arg0: i32) -> (i32, i32, i32) {
    %c0_i32 = arith.constant 0 : i32
    %c0_i32_0 = arith.constant 0 : i32
    %c0_i32_1 = arith.constant 0 : i32
    return %arg0, %c0_i32, %c0_i32_0 : i32, i32, i32
  }
  func.func @transform_4(%arg0: i32) -> (i32, i32, i32) {
    %c0_i32 = arith.constant 0 : i32
    %c0_i32_0 = arith.constant 0 : i32
    %c0_i32_1 = arith.constant 0 : i32
    return %arg0, %c0_i32, %c0_i32_0 : i32, i32, i32
  }
}

module attributes {stable_mosaic.version = 11 : i64} {
  func.func @_matmul_kernel(%arg0: i32, %arg1: memref<8x256xbf16, #tpu.memory_space<vmem>>, %arg2: memref<256x32xbf16, #tpu.memory_space<vmem>>, %arg3: memref<8x32xbf16, #tpu.memory_space<vmem>>, %arg4: memref<1x1x32xf32, #tpu.memory_space<vmem>>, %arg5: memref<1x1x32xf32, #tpu.memory_space<vmem>>) attributes {dimension_semantics = [#tpu.dimension_semantics<parallel>], iteration_bounds = array<i64: 1>, scalar_prefetch = 0 : i64, scratch_operands = 0 : i64, tpu.core_type = #tpu.core_type<tc>, window_params = [{transform_indices = @transform_0, window_bounds = array<i64: 8, 256>}, {pipeline_mode = #tpu.pipeline_mode<synchronous>, transform_indices = @transform_1, window_bounds = array<i64: 256, 32>}, {transform_indices = @transform_2, window_bounds = array<i64: 8, 32>}, {transform_indices = @transform_3, window_bounds = array<i64: 1, 1, 32>}, {transform_indices = @transform_4, window_bounds = array<i64: 1, 1, 32>}]} {
    %c0 = arith.constant 0 : index
    %c0_0 = arith.constant 0 : index
    %0 = vector.load %arg1[%c0, %c0_0] : memref<8x256xbf16, #tpu.memory_space<vmem>>, vector<8x256xbf16>
    %c0_1 = arith.constant 0 : index
    %c0_2 = arith.constant 0 : index
    %1 = vector.load %arg2[%c0_1, %c0_2] : memref<256x32xbf16, #tpu.memory_space<vmem>>, vector<256x32xbf16>
    %cst = arith.constant dense<0.000000e+00> : vector<8x32xf32>
    %2 = tpu.matmul %0, %1, %cst {dimension_numbers = #tpu.dot_dimension_numbers<[1], [0], [0], [1], [0, 0, 1, 1], [], []>} : vector<8x256xbf16>, vector<256x32xbf16>, vector<8x32xf32> -> vector<8x32xf32>
    %cst_3 = arith.constant dense<0.000000e+00> : vector<32xf32>
    %3 = vector.multi_reduction <add>, %2, %cst_3 [0] : vector<8x32xf32> to vector<32xf32>
    %4 = vector.shape_cast %3 : vector<32xf32> to vector<1x32xf32>
    %c0_4 = arith.constant 0 : index
    %c0_5 = arith.constant 0 : index
    %c0_6 = arith.constant 0 : index
    %5 = vector.load %arg4[%c0_4, %c0_5, %c0_6] : memref<1x1x32xf32, #tpu.memory_space<vmem>>, vector<1x1x32xf32>
    %6 = vector.shape_cast %5 : vector<1x1x32xf32> to vector<1x32xf32>
    %7 = vector.shape_cast %4 : vector<1x32xf32> to vector<1x1x32xf32>
    tpu.vector_store %arg4[%c0_4, %c0_5, %c0_6], %7 {strides = array<i32>} : memref<1x1x32xf32, #tpu.memory_space<vmem>>, vector<1x1x32xf32>,
    %8 = arith.mulf %2, %2 : vector<8x32xf32>
    %cst_7 = arith.constant dense<0.000000e+00> : vector<32xf32>
    %9 = vector.multi_reduction <add>, %8, %cst_7 [0] : vector<8x32xf32> to vector<32xf32>
    %10 = vector.shape_cast %9 : vector<32xf32> to vector<1x32xf32>
    %c0_8 = arith.constant 0 : index
    %c0_9 = arith.constant 0 : index
    %c0_10 = arith.constant 0 : index
    %11 = vector.load %arg5[%c0_8, %c0_9, %c0_10] : memref<1x1x32xf32, #tpu.memory_space<vmem>>, vector<1x1x32xf32>
    %12 = vector.shape_cast %11 : vector<1x1x32xf32> to vector<1x32xf32>
    %13 = vector.shape_cast %10 : vector<1x32xf32> to vector<1x1x32xf32>
    tpu.vector_store %arg5[%c0_8, %c0_9, %c0_10], %13 {strides = array<i32>} : memref<1x1x32xf32, #tpu.memory_space<vmem>>, vector<1x1x32xf32>,
    %14 = arith.truncf %2 : vector<8x32xf32> to vector<8x32xbf16>
    %c0_11 = arith.constant 0 : index
    %c0_12 = arith.constant 0 : index
    %15 = vector.load %arg3[%c0_11, %c0_12] : memref<8x32xbf16, #tpu.memory_space<vmem>>, vector<8x32xbf16>
    tpu.vector_store %arg3[%c0_11, %c0_12], %14 {strides = array<i32>} : memref<8x32xbf16, #tpu.memory_space<vmem>>, vector<8x32xbf16>,
    return
  }
  func.func @transform_0(%arg0: i32) -> (i32, i32) {
    %c0_i32 = arith.constant 0 : i32
    %c0_i32_0 = arith.constant 0 : i32
    return %arg0, %c0_i32 : i32, i32
  }
  func.func @transform_1(%arg0: i32) -> (i32, i32) {
    %c0_i32 = arith.constant 0 : i32
    %c0_i32_0 = arith.constant 0 : i32
    %c0_i32_1 = arith.constant 0 : i32
    return %c0_i32, %c0_i32_0 : i32, i32
  }
  func.func @transform_2(%arg0: i32) -> (i32, i32) {
    %c0_i32 = arith.constant 0 : i32
    %c0_i32_0 = arith.constant 0 : i32
    return %arg0, %c0_i32 : i32, i32
  }
  func.func @transform_3(%arg0: i32) -> (i32, i32, i32) {
    %c0_i32 = arith.constant 0 : i32
    %c0_i32_0 = arith.constant 0 : i32
    %c0_i32_1 = arith.constant 0 : i32
    return %arg0, %c0_i32, %c0_i32_0 : i32, i32, i32
  }
  func.func @transform_4(%arg0: i32) -> (i32, i32, i32) {
    %c0_i32 = arith.constant 0 : i32
    %c0_i32_0 = arith.constant 0 : i32
    %c0_i32_1 = arith.constant 0 : i32
    return %arg0, %c0_i32, %c0_i32_0 : i32, i32, i32
  }
}

module attributes {stable_mosaic.version = 11 : i64} {
  func.func @_matmul_kernel(%arg0: i32, %arg1: memref<8x288xbf16, #tpu.memory_space<vmem>>, %arg2: memref<288x32xbf16, #tpu.memory_space<vmem>>, %arg3: memref<8x32xbf16, #tpu.memory_space<vmem>>, %arg4: memref<1x1x32xf32, #tpu.memory_space<vmem>>, %arg5: memref<1x1x32xf32, #tpu.memory_space<vmem>>) attributes {dimension_semantics = [#tpu.dimension_semantics<parallel>], iteration_bounds = array<i64: 1>, scalar_prefetch = 0 : i64, scratch_operands = 0 : i64, tpu.core_type = #tpu.core_type<tc>, window_params = [{transform_indices = @transform_0, window_bounds = array<i64: 8, 288>}, {pipeline_mode = #tpu.pipeline_mode<synchronous>, transform_indices = @transform_1, window_bounds = array<i64: 288, 32>}, {transform_indices = @transform_2, window_bounds = array<i64: 8, 32>}, {transform_indices = @transform_3, window_bounds = array<i64: 1, 1, 32>}, {transform_indices = @transform_4, window_bounds = array<i64: 1, 1, 32>}]} {
    %c0 = arith.constant 0 : index
    %c0_0 = arith.constant 0 : index
    %0 = vector.load %arg1[%c0, %c0_0] : memref<8x288xbf16, #tpu.memory_space<vmem>>, vector<8x288xbf16>
    %c0_1 = arith.constant 0 : index
    %c0_2 = arith.constant 0 : index
    %1 = vector.load %arg2[%c0_1, %c0_2] : memref<288x32xbf16, #tpu.memory_space<vmem>>, vector<288x32xbf16>
    %cst = arith.constant dense<0.000000e+00> : vector<8x32xf32>
    %2 = tpu.matmul %0, %1, %cst {dimension_numbers = #tpu.dot_dimension_numbers<[1], [0], [0], [1], [0, 0, 1, 1], [], []>} : vector<8x288xbf16>, vector<288x32xbf16>, vector<8x32xf32> -> vector<8x32xf32>
    %cst_3 = arith.constant dense<0.000000e+00> : vector<32xf32>
    %3 = vector.multi_reduction <add>, %2, %cst_3 [0] : vector<8x32xf32> to vector<32xf32>
    %4 = vector.shape_cast %3 : vector<32xf32> to vector<1x32xf32>
    %c0_4 = arith.constant 0 : index
    %c0_5 = arith.constant 0 : index
    %c0_6 = arith.constant 0 : index
    %5 = vector.load %arg4[%c0_4, %c0_5, %c0_6] : memref<1x1x32xf32, #tpu.memory_space<vmem>>, vector<1x1x32xf32>
    %6 = vector.shape_cast %5 : vector<1x1x32xf32> to vector<1x32xf32>
    %7 = vector.shape_cast %4 : vector<1x32xf32> to vector<1x1x32xf32>
    tpu.vector_store %arg4[%c0_4, %c0_5, %c0_6], %7 {strides = array<i32>} : memref<1x1x32xf32, #tpu.memory_space<vmem>>, vector<1x1x32xf32>,
    %8 = arith.mulf %2, %2 : vector<8x32xf32>
    %cst_7 = arith.constant dense<0.000000e+00> : vector<32xf32>
    %9 = vector.multi_reduction <add>, %8, %cst_7 [0] : vector<8x32xf32> to vector<32xf32>
    %10 = vector.shape_cast %9 : vector<32xf32> to vector<1x32xf32>
    %c0_8 = arith.constant 0 : index
    %c0_9 = arith.constant 0 : index
    %c0_10 = arith.constant 0 : index
    %11 = vector.load %arg5[%c0_8, %c0_9, %c0_10] : memref<1x1x32xf32, #tpu.memory_space<vmem>>, vector<1x1x32xf32>
    %12 = vector.shape_cast %11 : vector<1x1x32xf32> to vector<1x32xf32>
    %13 = vector.shape_cast %10 : vector<1x32xf32> to vector<1x1x32xf32>
    tpu.vector_store %arg5[%c0_8, %c0_9, %c0_10], %13 {strides = array<i32>} : memref<1x1x32xf32, #tpu.memory_space<vmem>>, vector<1x1x32xf32>,
    %14 = arith.truncf %2 : vector<8x32xf32> to vector<8x32xbf16>
    %c0_11 = arith.constant 0 : index
    %c0_12 = arith.constant 0 : index
    %15 = vector.load %arg3[%c0_11, %c0_12] : memref<8x32xbf16, #tpu.memory_space<vmem>>, vector<8x32xbf16>
    tpu.vector_store %arg3[%c0_11, %c0_12], %14 {strides = array<i32>} : memref<8x32xbf16, #tpu.memory_space<vmem>>, vector<8x32xbf16>,
    return
  }
  func.func @transform_0(%arg0: i32) -> (i32, i32) {
    %c0_i32 = arith.constant 0 : i32
    %c0_i32_0 = arith.constant 0 : i32
    return %arg0, %c0_i32 : i32, i32
  }
  func.func @transform_1(%arg0: i32) -> (i32, i32) {
    %c0_i32 = arith.constant 0 : i32
    %c0_i32_0 = arith.constant 0 : i32
    %c0_i32_1 = arith.constant 0 : i32
    return %c0_i32, %c0_i32_0 : i32, i32
  }
  func.func @transform_2(%arg0: i32) -> (i32, i32) {
    %c0_i32 = arith.constant 0 : i32
    %c0_i32_0 = arith.constant 0 : i32
    return %arg0, %c0_i32 : i32, i32
  }
  func.func @transform_3(%arg0: i32) -> (i32, i32, i32) {
    %c0_i32 = arith.constant 0 : i32
    %c0_i32_0 = arith.constant 0 : i32
    %c0_i32_1 = arith.constant 0 : i32
    return %arg0, %c0_i32, %c0_i32_0 : i32, i32, i32
  }
  func.func @transform_4(%arg0: i32) -> (i32, i32, i32) {
    %c0_i32 = arith.constant 0 : i32
    %c0_i32_0 = arith.constant 0 : i32
    %c0_i32_1 = arith.constant 0 : i32
    return %arg0, %c0_i32, %c0_i32_0 : i32, i32, i32
  }
}

module attributes {stable_mosaic.version = 11 : i64} {
  func.func @_bn_res_kernel(%arg0: i32, %arg1: memref<8x32xbf16, #tpu.memory_space<vmem>>, %arg2: memref<1x32xf32, #tpu.memory_space<vmem>>, %arg3: memref<1x32xf32, #tpu.memory_space<vmem>>, %arg4: memref<8x32xbf16, #tpu.memory_space<vmem>>, %arg5: memref<1x32xf32, #tpu.memory_space<vmem>>, %arg6: memref<1x32xf32, #tpu.memory_space<vmem>>, %arg7: memref<8x32xbf16, #tpu.memory_space<vmem>>) attributes {dimension_semantics = [#tpu.dimension_semantics<parallel>], iteration_bounds = array<i64: 1>, scalar_prefetch = 0 : i64, scratch_operands = 0 : i64, tpu.core_type = #tpu.core_type<tc>, window_params = [{transform_indices = @transform_0, window_bounds = array<i64: 8, 32>}, {pipeline_mode = #tpu.pipeline_mode<synchronous>, transform_indices = @transform_1, window_bounds = array<i64: 1, 32>}, {pipeline_mode = #tpu.pipeline_mode<synchronous>, transform_indices = @transform_2, window_bounds = array<i64: 1, 32>}, {transform_indices = @transform_3, window_bounds = array<i64: 8, 32>}, {pipeline_mode = #tpu.pipeline_mode<synchronous>, transform_indices = @transform_4, window_bounds = array<i64: 1, 32>}, {pipeline_mode = #tpu.pipeline_mode<synchronous>, transform_indices = @transform_5, window_bounds = array<i64: 1, 32>}, {transform_indices = @transform_6, window_bounds = array<i64: 8, 32>}]} {
    %c0 = arith.constant 0 : index
    %c0_0 = arith.constant 0 : index
    %0 = vector.load %arg1[%c0, %c0_0] : memref<8x32xbf16, #tpu.memory_space<vmem>>, vector<8x32xbf16>
    %1 = arith.extf %0 : vector<8x32xbf16> to vector<8x32xf32>
    %c0_1 = arith.constant 0 : index
    %c0_2 = arith.constant 0 : index
    %2 = vector.load %arg2[%c0_1, %c0_2] : memref<1x32xf32, #tpu.memory_space<vmem>>, vector<1x32xf32>
    %3 = vector.broadcast %2 : vector<1x32xf32> to vector<8x32xf32>
    %4 = arith.mulf %1, %3 : vector<8x32xf32>
    %c0_3 = arith.constant 0 : index
    %c0_4 = arith.constant 0 : index
    %5 = vector.load %arg3[%c0_3, %c0_4] : memref<1x32xf32, #tpu.memory_space<vmem>>, vector<1x32xf32>
    %6 = vector.broadcast %5 : vector<1x32xf32> to vector<8x32xf32>
    %7 = arith.addf %4, %6 : vector<8x32xf32>
    %c0_5 = arith.constant 0 : index
    %c0_6 = arith.constant 0 : index
    %8 = vector.load %arg4[%c0_5, %c0_6] : memref<8x32xbf16, #tpu.memory_space<vmem>>, vector<8x32xbf16>
    %9 = arith.extf %8 : vector<8x32xbf16> to vector<8x32xf32>
    %c0_7 = arith.constant 0 : index
    %c0_8 = arith.constant 0 : index
    %10 = vector.load %arg5[%c0_7, %c0_8] : memref<1x32xf32, #tpu.memory_space<vmem>>, vector<1x32xf32>
    %11 = vector.broadcast %10 : vector<1x32xf32> to vector<8x32xf32>
    %12 = arith.mulf %9, %11 : vector<8x32xf32>
    %c0_9 = arith.constant 0 : index
    %c0_10 = arith.constant 0 : index
    %13 = vector.load %arg6[%c0_9, %c0_10] : memref<1x32xf32, #tpu.memory_space<vmem>>, vector<1x32xf32>
    %14 = vector.broadcast %13 : vector<1x32xf32> to vector<8x32xf32>
    %15 = arith.addf %12, %14 : vector<8x32xf32>
    %16 = arith.addf %7, %15 : vector<8x32xf32>
    %17 = arith.truncf %16 : vector<8x32xf32> to vector<8x32xbf16>
    %c0_11 = arith.constant 0 : index
    %c0_12 = arith.constant 0 : index
    %18 = vector.load %arg7[%c0_11, %c0_12] : memref<8x32xbf16, #tpu.memory_space<vmem>>, vector<8x32xbf16>
    tpu.vector_store %arg7[%c0_11, %c0_12], %17 {strides = array<i32>} : memref<8x32xbf16, #tpu.memory_space<vmem>>, vector<8x32xbf16>,
    return
  }
  func.func @transform_0(%arg0: i32) -> (i32, i32) {
    %c0_i32 = arith.constant 0 : i32
    %c0_i32_0 = arith.constant 0 : i32
    return %arg0, %c0_i32 : i32, i32
  }
  func.func @transform_1(%arg0: i32) -> (i32, i32) {
    %c0_i32 = arith.constant 0 : i32
    %c0_i32_0 = arith.constant 0 : i32
    %c0_i32_1 = arith.constant 0 : i32
    return %c0_i32, %c0_i32_0 : i32, i32
  }
  func.func @transform_2(%arg0: i32) -> (i32, i32) {
    %c0_i32 = arith.constant 0 : i32
    %c0_i32_0 = arith.constant 0 : i32
    %c0_i32_1 = arith.constant 0 : i32
    return %c0_i32, %c0_i32_0 : i32, i32
  }
  func.func @transform_3(%arg0: i32) -> (i32, i32) {
    %c0_i32 = arith.constant 0 : i32
    %c0_i32_0 = arith.constant 0 : i32
    return %arg0, %c0_i32 : i32, i32
  }
  func.func @transform_4(%arg0: i32) -> (i32, i32) {
    %c0_i32 = arith.constant 0 : i32
    %c0_i32_0 = arith.constant 0 : i32
    %c0_i32_1 = arith.constant 0 : i32
    return %c0_i32, %c0_i32_0 : i32, i32
  }
  func.func @transform_5(%arg0: i32) -> (i32, i32) {
    %c0_i32 = arith.constant 0 : i32
    %c0_i32_0 = arith.constant 0 : i32
    %c0_i32_1 = arith.constant 0 : i32
    return %c0_i32, %c0_i32_0 : i32, i32
  }
  func.func @transform_6(%arg0: i32) -> (i32, i32) {
    %c0_i32 = arith.constant 0 : i32
    %c0_i32_0 = arith.constant 0 : i32
    return %arg0, %c0_i32 : i32, i32
  }
}

module attributes {stable_mosaic.version = 11 : i64} {
  func.func @_bn_res_kernel(%arg0: i32, %arg1: memref<8x32xbf16, #tpu.memory_space<vmem>>, %arg2: memref<1x32xf32, #tpu.memory_space<vmem>>, %arg3: memref<1x32xf32, #tpu.memory_space<vmem>>, %arg4: memref<8x32xbf16, #tpu.memory_space<vmem>>, %arg5: memref<1x32xf32, #tpu.memory_space<vmem>>, %arg6: memref<1x32xf32, #tpu.memory_space<vmem>>, %arg7: memref<8x32xbf16, #tpu.memory_space<vmem>>) attributes {dimension_semantics = [#tpu.dimension_semantics<parallel>], iteration_bounds = array<i64: 1>, scalar_prefetch = 0 : i64, scratch_operands = 0 : i64, tpu.core_type = #tpu.core_type<tc>, window_params = [{transform_indices = @transform_0, window_bounds = array<i64: 8, 32>}, {pipeline_mode = #tpu.pipeline_mode<synchronous>, transform_indices = @transform_1, window_bounds = array<i64: 1, 32>}, {pipeline_mode = #tpu.pipeline_mode<synchronous>, transform_indices = @transform_2, window_bounds = array<i64: 1, 32>}, {transform_indices = @transform_3, window_bounds = array<i64: 8, 32>}, {pipeline_mode = #tpu.pipeline_mode<synchronous>, transform_indices = @transform_4, window_bounds = array<i64: 1, 32>}, {pipeline_mode = #tpu.pipeline_mode<synchronous>, transform_indices = @transform_5, window_bounds = array<i64: 1, 32>}, {transform_indices = @transform_6, window_bounds = array<i64: 8, 32>}]} {
    %c0 = arith.constant 0 : index
    %c0_0 = arith.constant 0 : index
    %0 = vector.load %arg1[%c0, %c0_0] : memref<8x32xbf16, #tpu.memory_space<vmem>>, vector<8x32xbf16>
    %1 = arith.extf %0 : vector<8x32xbf16> to vector<8x32xf32>
    %c0_1 = arith.constant 0 : index
    %c0_2 = arith.constant 0 : index
    %2 = vector.load %arg2[%c0_1, %c0_2] : memref<1x32xf32, #tpu.memory_space<vmem>>, vector<1x32xf32>
    %3 = vector.broadcast %2 : vector<1x32xf32> to vector<8x32xf32>
    %4 = arith.mulf %1, %3 : vector<8x32xf32>
    %c0_3 = arith.constant 0 : index
    %c0_4 = arith.constant 0 : index
    %5 = vector.load %arg3[%c0_3, %c0_4] : memref<1x32xf32, #tpu.memory_space<vmem>>, vector<1x32xf32>
    %6 = vector.broadcast %5 : vector<1x32xf32> to vector<8x32xf32>
    %7 = arith.addf %4, %6 : vector<8x32xf32>
    %c0_5 = arith.constant 0 : index
    %c0_6 = arith.constant 0 : index
    %8 = vector.load %arg4[%c0_5, %c0_6] : memref<8x32xbf16, #tpu.memory_space<vmem>>, vector<8x32xbf16>
    %9 = arith.extf %8 : vector<8x32xbf16> to vector<8x32xf32>
    %c0_7 = arith.constant 0 : index
    %c0_8 = arith.constant 0 : index
    %10 = vector.load %arg5[%c0_7, %c0_8] : memref<1x32xf32, #tpu.memory_space<vmem>>, vector<1x32xf32>
    %11 = vector.broadcast %10 : vector<1x32xf32> to vector<8x32xf32>
    %12 = arith.mulf %9, %11 : vector<8x32xf32>
    %c0_9 = arith.constant 0 : index
    %c0_10 = arith.constant 0 : index
    %13 = vector.load %arg6[%c0_9, %c0_10] : memref<1x32xf32, #tpu.memory_space<vmem>>, vector<1x32xf32>
    %14 = vector.broadcast %13 : vector<1x32xf32> to vector<8x32xf32>
    %15 = arith.addf %12, %14 : vector<8x32xf32>
    %cst = arith.constant 0.000000e+00 : f32
    %16 = vector.broadcast %cst : f32 to vector<8x32xf32>
    %17 = arith.maximumf %15, %16 : vector<8x32xf32>
    %18 = arith.addf %7, %17 : vector<8x32xf32>
    %19 = arith.truncf %18 : vector<8x32xf32> to vector<8x32xbf16>
    %c0_11 = arith.constant 0 : index
    %c0_12 = arith.constant 0 : index
    %20 = vector.load %arg7[%c0_11, %c0_12] : memref<8x32xbf16, #tpu.memory_space<vmem>>, vector<8x32xbf16>
    tpu.vector_store %arg7[%c0_11, %c0_12], %19 {strides = array<i32>} : memref<8x32xbf16, #tpu.memory_space<vmem>>, vector<8x32xbf16>,
    return
  }
  func.func @transform_0(%arg0: i32) -> (i32, i32) {
    %c0_i32 = arith.constant 0 : i32
    %c0_i32_0 = arith.constant 0 : i32
    return %arg0, %c0_i32 : i32, i32
  }
  func.func @transform_1(%arg0: i32) -> (i32, i32) {
    %c0_i32 = arith.constant 0 : i32
    %c0_i32_0 = arith.constant 0 : i32
    %c0_i32_1 = arith.constant 0 : i32
    return %c0_i32, %c0_i32_0 : i32, i32
  }
  func.func @transform_2(%arg0: i32) -> (i32, i32) {
    %c0_i32 = arith.constant 0 : i32
    %c0_i32_0 = arith.constant 0 : i32
    %c0_i32_1 = arith.constant 0 : i32
    return %c0_i32, %c0_i32_0 : i32, i32
  }
  func.func @transform_3(%arg0: i32) -> (i32, i32) {
    %c0_i32 = arith.constant 0 : i32
    %c0_i32_0 = arith.constant 0 : i32
    return %arg0, %c0_i32 : i32, i32
  }
  func.func @transform_4(%arg0: i32) -> (i32, i32) {
    %c0_i32 = arith.constant 0 : i32
    %c0_i32_0 = arith.constant 0 : i32
    %c0_i32_1 = arith.constant 0 : i32
    return %c0_i32, %c0_i32_0 : i32, i32
  }
  func.func @transform_5(%arg0: i32) -> (i32, i32) {
    %c0_i32 = arith.constant 0 : i32
    %c0_i32_0 = arith.constant 0 : i32
    %c0_i32_1 = arith.constant 0 : i32
    return %c0_i32, %c0_i32_0 : i32, i32
  }
  func.func @transform_6(%arg0: i32) -> (i32, i32) {
    %c0_i32 = arith.constant 0 : i32
    %c0_i32_0 = arith.constant 0 : i32
    return %arg0, %c0_i32 : i32, i32
  }
}

module attributes {stable_mosaic.version = 11 : i64} {
  func.func @_matmul_kernel(%arg0: i32, %arg1: memref<8x288xbf16, #tpu.memory_space<vmem>>, %arg2: memref<288x64xbf16, #tpu.memory_space<vmem>>, %arg3: memref<8x64xbf16, #tpu.memory_space<vmem>>, %arg4: memref<1x1x64xf32, #tpu.memory_space<vmem>>, %arg5: memref<1x1x64xf32, #tpu.memory_space<vmem>>) attributes {dimension_semantics = [#tpu.dimension_semantics<parallel>], iteration_bounds = array<i64: 1>, scalar_prefetch = 0 : i64, scratch_operands = 0 : i64, tpu.core_type = #tpu.core_type<tc>, window_params = [{transform_indices = @transform_0, window_bounds = array<i64: 8, 288>}, {pipeline_mode = #tpu.pipeline_mode<synchronous>, transform_indices = @transform_1, window_bounds = array<i64: 288, 64>}, {transform_indices = @transform_2, window_bounds = array<i64: 8, 64>}, {transform_indices = @transform_3, window_bounds = array<i64: 1, 1, 64>}, {transform_indices = @transform_4, window_bounds = array<i64: 1, 1, 64>}]} {
    %c0 = arith.constant 0 : index
    %c0_0 = arith.constant 0 : index
    %0 = vector.load %arg1[%c0, %c0_0] : memref<8x288xbf16, #tpu.memory_space<vmem>>, vector<8x288xbf16>
    %c0_1 = arith.constant 0 : index
    %c0_2 = arith.constant 0 : index
    %1 = vector.load %arg2[%c0_1, %c0_2] : memref<288x64xbf16, #tpu.memory_space<vmem>>, vector<288x64xbf16>
    %cst = arith.constant dense<0.000000e+00> : vector<8x64xf32>
    %2 = tpu.matmul %0, %1, %cst {dimension_numbers = #tpu.dot_dimension_numbers<[1], [0], [0], [1], [0, 0, 1, 1], [], []>} : vector<8x288xbf16>, vector<288x64xbf16>, vector<8x64xf32> -> vector<8x64xf32>
    %cst_3 = arith.constant dense<0.000000e+00> : vector<64xf32>
    %3 = vector.multi_reduction <add>, %2, %cst_3 [0] : vector<8x64xf32> to vector<64xf32>
    %4 = vector.shape_cast %3 : vector<64xf32> to vector<1x64xf32>
    %c0_4 = arith.constant 0 : index
    %c0_5 = arith.constant 0 : index
    %c0_6 = arith.constant 0 : index
    %5 = vector.load %arg4[%c0_4, %c0_5, %c0_6] : memref<1x1x64xf32, #tpu.memory_space<vmem>>, vector<1x1x64xf32>
    %6 = vector.shape_cast %5 : vector<1x1x64xf32> to vector<1x64xf32>
    %7 = vector.shape_cast %4 : vector<1x64xf32> to vector<1x1x64xf32>
    tpu.vector_store %arg4[%c0_4, %c0_5, %c0_6], %7 {strides = array<i32>} : memref<1x1x64xf32, #tpu.memory_space<vmem>>, vector<1x1x64xf32>,
    %8 = arith.mulf %2, %2 : vector<8x64xf32>
    %cst_7 = arith.constant dense<0.000000e+00> : vector<64xf32>
    %9 = vector.multi_reduction <add>, %8, %cst_7 [0] : vector<8x64xf32> to vector<64xf32>
    %10 = vector.shape_cast %9 : vector<64xf32> to vector<1x64xf32>
    %c0_8 = arith.constant 0 : index
    %c0_9 = arith.constant 0 : index
    %c0_10 = arith.constant 0 : index
    %11 = vector.load %arg5[%c0_8, %c0_9, %c0_10] : memref<1x1x64xf32, #tpu.memory_space<vmem>>, vector<1x1x64xf32>
    %12 = vector.shape_cast %11 : vector<1x1x64xf32> to vector<1x64xf32>
    %13 = vector.shape_cast %10 : vector<1x64xf32> to vector<1x1x64xf32>
    tpu.vector_store %arg5[%c0_8, %c0_9, %c0_10], %13 {strides = array<i32>} : memref<1x1x64xf32, #tpu.memory_space<vmem>>, vector<1x1x64xf32>,
    %14 = arith.truncf %2 : vector<8x64xf32> to vector<8x64xbf16>
    %c0_11 = arith.constant 0 : index
    %c0_12 = arith.constant 0 : index
    %15 = vector.load %arg3[%c0_11, %c0_12] : memref<8x64xbf16, #tpu.memory_space<vmem>>, vector<8x64xbf16>
    tpu.vector_store %arg3[%c0_11, %c0_12], %14 {strides = array<i32>} : memref<8x64xbf16, #tpu.memory_space<vmem>>, vector<8x64xbf16>,
    return
  }
  func.func @transform_0(%arg0: i32) -> (i32, i32) {
    %c0_i32 = arith.constant 0 : i32
    %c0_i32_0 = arith.constant 0 : i32
    return %arg0, %c0_i32 : i32, i32
  }
  func.func @transform_1(%arg0: i32) -> (i32, i32) {
    %c0_i32 = arith.constant 0 : i32
    %c0_i32_0 = arith.constant 0 : i32
    %c0_i32_1 = arith.constant 0 : i32
    return %c0_i32, %c0_i32_0 : i32, i32
  }
  func.func @transform_2(%arg0: i32) -> (i32, i32) {
    %c0_i32 = arith.constant 0 : i32
    %c0_i32_0 = arith.constant 0 : i32
    return %arg0, %c0_i32 : i32, i32
  }
  func.func @transform_3(%arg0: i32) -> (i32, i32, i32) {
    %c0_i32 = arith.constant 0 : i32
    %c0_i32_0 = arith.constant 0 : i32
    %c0_i32_1 = arith.constant 0 : i32
    return %arg0, %c0_i32, %c0_i32_0 : i32, i32, i32
  }
  func.func @transform_4(%arg0: i32) -> (i32, i32, i32) {
    %c0_i32 = arith.constant 0 : i32
    %c0_i32_0 = arith.constant 0 : i32
    %c0_i32_1 = arith.constant 0 : i32
    return %arg0, %c0_i32, %c0_i32_0 : i32, i32, i32
  }
}

module attributes {stable_mosaic.version = 11 : i64} {
  func.func @_matmul_kernel(%arg0: i32, %arg1: memref<32x144xbf16, #tpu.memory_space<vmem>>, %arg2: memref<144x32xbf16, #tpu.memory_space<vmem>>, %arg3: memref<32x32xbf16, #tpu.memory_space<vmem>>, %arg4: memref<1x1x32xf32, #tpu.memory_space<vmem>>, %arg5: memref<1x1x32xf32, #tpu.memory_space<vmem>>) attributes {dimension_semantics = [#tpu.dimension_semantics<parallel>], iteration_bounds = array<i64: 1>, scalar_prefetch = 0 : i64, scratch_operands = 0 : i64, tpu.core_type = #tpu.core_type<tc>, window_params = [{transform_indices = @transform_0, window_bounds = array<i64: 32, 144>}, {pipeline_mode = #tpu.pipeline_mode<synchronous>, transform_indices = @transform_1, window_bounds = array<i64: 144, 32>}, {transform_indices = @transform_2, window_bounds = array<i64: 32, 32>}, {transform_indices = @transform_3, window_bounds = array<i64: 1, 1, 32>}, {transform_indices = @transform_4, window_bounds = array<i64: 1, 1, 32>}]} {
    %c0 = arith.constant 0 : index
    %c0_0 = arith.constant 0 : index
    %0 = vector.load %arg1[%c0, %c0_0] : memref<32x144xbf16, #tpu.memory_space<vmem>>, vector<32x144xbf16>
    %c0_1 = arith.constant 0 : index
    %c0_2 = arith.constant 0 : index
    %1 = vector.load %arg2[%c0_1, %c0_2] : memref<144x32xbf16, #tpu.memory_space<vmem>>, vector<144x32xbf16>
    %cst = arith.constant dense<0.000000e+00> : vector<32x32xf32>
    %2 = tpu.matmul %0, %1, %cst {dimension_numbers = #tpu.dot_dimension_numbers<[1], [0], [0], [1], [0, 0, 1, 1], [], []>} : vector<32x144xbf16>, vector<144x32xbf16>, vector<32x32xf32> -> vector<32x32xf32>
    %cst_3 = arith.constant dense<0.000000e+00> : vector<32xf32>
    %3 = vector.multi_reduction <add>, %2, %cst_3 [0] : vector<32x32xf32> to vector<32xf32>
    %4 = vector.shape_cast %3 : vector<32xf32> to vector<1x32xf32>
    %c0_4 = arith.constant 0 : index
    %c0_5 = arith.constant 0 : index
    %c0_6 = arith.constant 0 : index
    %5 = vector.load %arg4[%c0_4, %c0_5, %c0_6] : memref<1x1x32xf32, #tpu.memory_space<vmem>>, vector<1x1x32xf32>
    %6 = vector.shape_cast %5 : vector<1x1x32xf32> to vector<1x32xf32>
    %7 = vector.shape_cast %4 : vector<1x32xf32> to vector<1x1x32xf32>
    tpu.vector_store %arg4[%c0_4, %c0_5, %c0_6], %7 {strides = array<i32>} : memref<1x1x32xf32, #tpu.memory_space<vmem>>, vector<1x1x32xf32>,
    %8 = arith.mulf %2, %2 : vector<32x32xf32>
    %cst_7 = arith.constant dense<0.000000e+00> : vector<32xf32>
    %9 = vector.multi_reduction <add>, %8, %cst_7 [0] : vector<32x32xf32> to vector<32xf32>
    %10 = vector.shape_cast %9 : vector<32xf32> to vector<1x32xf32>
    %c0_8 = arith.constant 0 : index
    %c0_9 = arith.constant 0 : index
    %c0_10 = arith.constant 0 : index
    %11 = vector.load %arg5[%c0_8, %c0_9, %c0_10] : memref<1x1x32xf32, #tpu.memory_space<vmem>>, vector<1x1x32xf32>
    %12 = vector.shape_cast %11 : vector<1x1x32xf32> to vector<1x32xf32>
    %13 = vector.shape_cast %10 : vector<1x32xf32> to vector<1x1x32xf32>
    tpu.vector_store %arg5[%c0_8, %c0_9, %c0_10], %13 {strides = array<i32>} : memref<1x1x32xf32, #tpu.memory_space<vmem>>, vector<1x1x32xf32>,
    %14 = arith.truncf %2 : vector<32x32xf32> to vector<32x32xbf16>
    %c0_11 = arith.constant 0 : index
    %c0_12 = arith.constant 0 : index
    %15 = vector.load %arg3[%c0_11, %c0_12] : memref<32x32xbf16, #tpu.memory_space<vmem>>, vector<32x32xbf16>
    tpu.vector_store %arg3[%c0_11, %c0_12], %14 {strides = array<i32>} : memref<32x32xbf16, #tpu.memory_space<vmem>>, vector<32x32xbf16>,
    return
  }
  func.func @transform_0(%arg0: i32) -> (i32, i32) {
    %c0_i32 = arith.constant 0 : i32
    %c0_i32_0 = arith.constant 0 : i32
    return %arg0, %c0_i32 : i32, i32
  }
  func.func @transform_1(%arg0: i32) -> (i32, i32) {
    %c0_i32 = arith.constant 0 : i32
    %c0_i32_0 = arith.constant 0 : i32
    %c0_i32_1 = arith.constant 0 : i32
    return %c0_i32, %c0_i32_0 : i32, i32
  }
  func.func @transform_2(%arg0: i32) -> (i32, i32) {
    %c0_i32 = arith.constant 0 : i32
    %c0_i32_0 = arith.constant 0 : i32
    return %arg0, %c0_i32 : i32, i32
  }
  func.func @transform_3(%arg0: i32) -> (i32, i32, i32) {
    %c0_i32 = arith.constant 0 : i32
    %c0_i32_0 = arith.constant 0 : i32
    %c0_i32_1 = arith.constant 0 : i32
    return %arg0, %c0_i32, %c0_i32_0 : i32, i32, i32
  }
  func.func @transform_4(%arg0: i32) -> (i32, i32, i32) {
    %c0_i32 = arith.constant 0 : i32
    %c0_i32_0 = arith.constant 0 : i32
    %c0_i32_1 = arith.constant 0 : i32
    return %arg0, %c0_i32, %c0_i32_0 : i32, i32, i32
  }
}

module attributes {stable_mosaic.version = 11 : i64} {
  func.func @_matmul_kernel(%arg0: i32, %arg1: memref<128x72xbf16, #tpu.memory_space<vmem>>, %arg2: memref<72x12xbf16, #tpu.memory_space<vmem>>, %arg3: memref<128x12xbf16, #tpu.memory_space<vmem>>) attributes {dimension_semantics = [#tpu.dimension_semantics<parallel>], iteration_bounds = array<i64: 1>, scalar_prefetch = 0 : i64, scratch_operands = 0 : i64, tpu.core_type = #tpu.core_type<tc>, window_params = [{transform_indices = @transform_0, window_bounds = array<i64: 128, 72>}, {pipeline_mode = #tpu.pipeline_mode<synchronous>, transform_indices = @transform_1, window_bounds = array<i64: 72, 12>}, {transform_indices = @transform_2, window_bounds = array<i64: 128, 12>}]} {
    %c0 = arith.constant 0 : index
    %c0_0 = arith.constant 0 : index
    %0 = vector.load %arg1[%c0, %c0_0] : memref<128x72xbf16, #tpu.memory_space<vmem>>, vector<128x72xbf16>
    %c0_1 = arith.constant 0 : index
    %c0_2 = arith.constant 0 : index
    %1 = vector.load %arg2[%c0_1, %c0_2] : memref<72x12xbf16, #tpu.memory_space<vmem>>, vector<72x12xbf16>
    %cst = arith.constant dense<0.000000e+00> : vector<128x12xf32>
    %2 = tpu.matmul %0, %1, %cst {dimension_numbers = #tpu.dot_dimension_numbers<[1], [0], [0], [1], [0, 0, 1, 1], [], []>} : vector<128x72xbf16>, vector<72x12xbf16>, vector<128x12xf32> -> vector<128x12xf32>
    %3 = math.tanh %2 : vector<128x12xf32>
    %4 = arith.truncf %3 : vector<128x12xf32> to vector<128x12xbf16>
    %c0_3 = arith.constant 0 : index
    %c0_4 = arith.constant 0 : index
    %5 = vector.load %arg3[%c0_3, %c0_4] : memref<128x12xbf16, #tpu.memory_space<vmem>>, vector<128x12xbf16>
    tpu.vector_store %arg3[%c0_3, %c0_4], %4 {strides = array<i32>} : memref<128x12xbf16, #tpu.memory_space<vmem>>, vector<128x12xbf16>,
    return
  }
  func.func @transform_0(%arg0: i32) -> (i32, i32) {
    %c0_i32 = arith.constant 0 : i32
    %c0_i32_0 = arith.constant 0 : i32
    return %arg0, %c0_i32 : i32, i32
  }
  func.func @transform_1(%arg0: i32) -> (i32, i32) {
    %c0_i32 = arith.constant 0 : i32
    %c0_i32_0 = arith.constant 0 : i32
    %c0_i32_1 = arith.constant 0 : i32
    return %c0_i32, %c0_i32_0 : i32, i32
  }
  func.func @transform_2(%arg0: i32) -> (i32, i32) {
    %c0_i32 = arith.constant 0 : i32
    %c0_i32_0 = arith.constant 0 : i32
    return %arg0, %c0_i32 : i32, i32
  }
}

</mosaic_0001>

<bundles_post_ra>
// kernel: generator_forward.12
= control target key start
LH: loop header
LB: loop body
LE: loop exit
PB: predicated region body
PF: predicated region fallthrough
CT: control target
= control target key end

     0   :  { %vm92_vm0 = vcmask 392192   ;;  %vm294_vm1 = vcmask 60416   ;;  %s536_s1 = inlined_call_operand.vmem [shape: bf16[48,8], index: 1, kind: input, shape index: {}]   ;;  %s537_s0 = inlined_call_operand.vmem [shape: bf16[128,48], index: 0, kind: input, shape index: {}]   ;;  %s538_s2 = inlined_call_operand.vmem [shape: bf16[128,8], index: 2, kind: output, shape index: {}]  }
   0x1   :  { %v405_v0 = vld [vmem:[%s536_s1] sm:$0xff]   ;;  %v406_v1 = vld [vmem:[%s536_s1 + $0x8] sm:$0xff]   ;;  %v407_v2 = vld [vmem:[%s536_s1 + $0x10] sm:$0xff]  }
   0x2   :  { %377 = vmatprep.subr.bf16.mxu0 %v405_v0  ;;  %399 = vmatprep.subr.bf16.mxu1 %v405_v0  ;;  %v408_v3 = vld [vmem:[%s537_s0] sm:$0xff]   ;;  %v410_v5 = vld [vmem:[%s537_s0 + $0x8] sm:$0xff]   ;;  %v412_v7 = vld [vmem:[%s537_s0 + $0x10] sm:$0xff]  }
   0x3   :  { %378 = vmatpush3.bf16.msra.mxu0 %v405_v0  ;;  %402 = vmatpush3.bf16.msra.mxu1 %v405_v0  ;;  %v409_v4 = vld [vmem:[%s537_s0 + $0x20] sm:$0xff]   ;;  %v411_v6 = vld [vmem:[%s537_s0 + $0x28] sm:$0xff]   ;;  %v413_v8 = vld [vmem:[%s537_s0 + $0x30] sm:$0xff]  }
   0x4   :  { %379 = vmatprep.subr.bf16.mxu0 %v406_v1  ;;  %400 = vmatprep.subr.bf16.mxu1 %v406_v1  ;;  %v414_v9 = vld [vmem:[%s537_s0 + $0x18] sm:$0xff]  }
   0x5   :  { %383 = vmatprep.mubr.msk.bf16.mxu0 %vm92_vm0, %v408_v3  ;;  %391 = vmatprep.mubr.msk.bf16.mxu1 %vm92_vm0, %v409_v4  ;;  %v415_v10 = vld [vmem:[%s537_s0 + $0x38] sm:$0xff]  }
   0x7   :  { %380 = vmatpush3.bf16.msra.mxu0 %v406_v1  ;;  %403 = vmatpush3.bf16.msra.mxu1 %v406_v1 }
   0x8   :  { %381 = vmatprep.subr.bf16.mxu0 %v407_v2  ;;  %401 = vmatprep.subr.bf16.mxu1 %v407_v2 }
   0xb   :  { %382 = vmatpush3.bf16.msra.mxu0 %v407_v2  ;;  %404 = vmatpush3.bf16.msra.mxu1 %v407_v2 }
   0xe   :  { %384 = vmatmul.mubr.msk.bf16.vlgmr.msra.gmra.mrb[0].mxu0 %vm92_vm0, %v410_v5  ;;  %392 = vmatmul.mubr.msk.bf16.vlgmr.msra.gmra.mrb[0].mxu1 %vm92_vm0, %v411_v6 }
   0xf   :  { %387 = vmatprep.mubr.msk.bf16.mxu0 %vm92_vm0, %v412_v7  ;;  %395 = vmatprep.mubr.msk.bf16.mxu1 %vm92_vm0, %v413_v8 }
  0x16   :  { %388 = vmatmul.mubr.msk.bf16.gmra.mrb[4].mxu0 %vm92_vm0, %v414_v9  ;;  %396 = vmatmul.mubr.msk.bf16.gmra.mrb[4].mxu1 %vm92_vm0, %v415_v10 }
  0xe1   :  { %v385_v11 = vpop.f32.mrb[0].mxu0  ;;  %v393_v12 = vpop.f32.mrb[0].mxu1 }
  0xe2   :  { %v216_v13 = vmax.f32 %v385_v11, 0.0  ;;  %v224_v14 = vmax.f32 %v393_v12, 0.0  ;;  %v151_v15 = vpop.f32.mrb[1].mxu0  ;;  %v183_v16 = vpop.f32.mrb[1].mxu1 }
  0xe3   :  { %v214_v17 = vmax.f32 %v151_v15, 0.0  ;;  %v222_v18 = vmax.f32 %v183_v16, 0.0  ;;  %v386_v19 = vpop.f32.mrb[2].mxu0  ;;  %v394_v20 = vpop.f32.mrb[2].mxu1 }
  0xe4   :  { %v352_v21 = vpack.c.bf16 %v216_v13, %v216_v13  ;;  %v360_v22 = vpack.c.bf16 %v224_v14, %v224_v14  ;;  %v217_v23 = vmax.f32 %v386_v19, 0.0  ;;  %v225_v24 = vmax.f32 %v394_v20, 0.0  ;;  %v154_v25 = vpop.f32.mrb[3].mxu0  ;;  %v186_v26 = vpop.f32.mrb[3].mxu1 }
  0xe5   :  { %v350_v27 = vpack.c.bf16 %v214_v17, %v214_v17  ;;  %v358_v28 = vpack.c.bf16 %v222_v18, %v222_v18  ;;  %v215_v29 = vmax.f32 %v154_v25, 0.0  ;;  %v223_v30 = vmax.f32 %v186_v26, 0.0 }
  0xe6   :  { %297 = vst.msk [vmem:[%s538_s2 + $0x8] sm:$0xf] %vm294_vm1, %v352_v21  ;;  %305 = vst.msk [vmem:[%s538_s2 + $0x28] sm:$0xf] %vm294_vm1, %v360_v22  ;;  %v353_v31 = vpack.c.bf16 %v217_v23, %v217_v23  ;;  %v361_v32 = vpack.c.bf16 %v225_v24, %v225_v24 }
  0xe7   :  { %295 = vst.msk [vmem:[%s538_s2] sm:$0xf] %vm294_vm1, %v350_v27  ;;  %303 = vst.msk [vmem:[%s538_s2 + $0x20] sm:$0xf] %vm294_vm1, %v358_v28  ;;  %v351_v33 = vpack.c.bf16 %v215_v29, %v215_v29  ;;  %v359_v34 = vpack.c.bf16 %v223_v30, %v223_v30 }
  0xe8   :  { %298 = vst.msk [vmem:[%s538_s2 + $0xc] sm:$0xf] %vm294_vm1, %v353_v31  ;;  %306 = vst.msk [vmem:[%s538_s2 + $0x2c] sm:$0xf] %vm294_vm1, %v361_v32 }
  0xe9   :  { %296 = vst.msk [vmem:[%s538_s2 + $0x4] sm:$0xf] %vm294_vm1, %v351_v33  ;;  %304 = vst.msk [vmem:[%s538_s2 + $0x24] sm:$0xf] %vm294_vm1, %v359_v34  ;;  %v389_v35 = vpop.f32.mrb[4].mxu0  ;;  %v397_v36 = vpop.f32.mrb[4].mxu1 }
  0xea   :  { %v220_v37 = vmax.f32 %v389_v35, 0.0  ;;  %v228_v38 = vmax.f32 %v397_v36, 0.0  ;;  %v167_v39 = vpop.f32.mrb[5].mxu0  ;;  %v199_v40 = vpop.f32.mrb[5].mxu1 }
  0xeb   :  { %v218_v41 = vmax.f32 %v167_v39, 0.0  ;;  %v226_v42 = vmax.f32 %v199_v40, 0.0  ;;  %v390_v43 = vpop.f32.mrb[6].mxu0  ;;  %v398_v44 = vpop.f32.mrb[6].mxu1 }
  0xec   :  { %v356_v45 = vpack.c.bf16 %v220_v37, %v220_v37  ;;  %v364_v46 = vpack.c.bf16 %v228_v38, %v228_v38  ;;  %v221_v47 = vmax.f32 %v390_v43, 0.0  ;;  %v229_v48 = vmax.f32 %v398_v44, 0.0  ;;  %v170_v49 = vpop.f32.mrb[7].mxu0  ;;  %v202_v50 = vpop.f32.mrb[7].mxu1 }
  0xed   :  { %v354_v51 = vpack.c.bf16 %v218_v41, %v218_v41  ;;  %v362_v52 = vpack.c.bf16 %v226_v42, %v226_v42  ;;  %v219_v53 = vmax.f32 %v170_v49, 0.0  ;;  %v227_v54 = vmax.f32 %v202_v50, 0.0 }
  0xee   :  { %301 = vst.msk [vmem:[%s538_s2 + $0x18] sm:$0xf] %vm294_vm1, %v356_v45  ;;  %309 = vst.msk [vmem:[%s538_s2 + $0x38] sm:$0xf] %vm294_vm1, %v364_v46  ;;  %v357_v55 = vpack.c.bf16 %v221_v47, %v221_v47  ;;  %v365_v56 = vpack.c.bf16 %v229_v48, %v229_v48 }
  0xef   :  { %299 = vst.msk [vmem:[%s538_s2 + $0x10] sm:$0xf] %vm294_vm1, %v354_v51  ;;  %307 = vst.msk [vmem:[%s538_s2 + $0x30] sm:$0xf] %vm294_vm1, %v362_v52  ;;  %v355_v57 = vpack.c.bf16 %v219_v53, %v219_v53  ;;  %v363_v58 = vpack.c.bf16 %v227_v54, %v227_v54 }
  0xf0   :  { %302 = vst.msk [vmem:[%s538_s2 + $0x1c] sm:$0xf] %vm294_vm1, %v357_v55  ;;  %310 = vst.msk [vmem:[%s538_s2 + $0x3c] sm:$0xf] %vm294_vm1, %v365_v56 }
  0xf1   :  { %300 = vst.msk [vmem:[%s538_s2 + $0x14] sm:$0xf] %vm294_vm1, %v355_v57  ;;  %308 = vst.msk [vmem:[%s538_s2 + $0x34] sm:$0xf] %vm294_vm1, %v363_v58 }

// kernel: generator_forward.13
= control target key start
LH: loop header
LB: loop body
LE: loop exit
PB: predicated region body
PF: predicated region fallthrough
CT: control target
= control target key end

     0   :  { %vm194_vm0 = vcmask 125952   ;;  %vm144_vm1 = vcmask 130048   ;;  %vm158_vm2 = vcmask 122880   ;;  %s354_s1 = inlined_call_operand.vmem [shape: bf16[128,16], index: 1, kind: input, shape index: {}]   ;;  %s355_s0 = inlined_call_operand.vmem [shape: bf16[32,128], index: 0, kind: input, shape index: {}]   ;;  %s356_s2 = inlined_call_operand.vmem [shape: bf16[32,16], index: 2, kind: output, shape index: {0}]   ;;  %s357_s3 = inlined_call_operand.vmem [shape: f32[1,1,16], index: 3, kind: output, shape index: {1}]   ;;  %s358_s4 = inlined_call_operand.vmem [shape: f32[1,1,16], index: 4, kind: output, shape index: {2}]  }
   0x1   :  { %v259_v0 = vld [vmem:[%s354_s1] sm:$0xff]   ;;  %v260_v1 = vld [vmem:[%s354_s1 + $0x8] sm:$0xff]   ;;  %v261_v2 = vld [vmem:[%s354_s1 + $0x10] sm:$0xff]  }
   0x2   :  { %239 = vmatprep.subr.bf16.mxu0 %v259_v0  ;;  %v262_v3 = vld [vmem:[%s354_s1 + $0x18] sm:$0xff]   ;;  %v267_v4 = vld [vmem:[%s355_s0] sm:$0xff]   ;;  %v264_v6 = vld [vmem:[%s354_s1 + $0x28] sm:$0xff]  }
   0x3   :  { %240 = vmatpush3.bf16.msra.mxu0 %v259_v0  ;;  %255 = vmatprep.mubr.bf16.mxu0 %v267_v4  ;;  %v263_v5 = vld [vmem:[%s354_s1 + $0x20] sm:$0xff]   ;;  %v265_v7 = vld [vmem:[%s354_s1 + $0x30] sm:$0xff]   ;;  %v266_v8 = vld [vmem:[%s354_s1 + $0x38] sm:$0xff]  }
   0x4   :  { %241 = vmatprep.subr.bf16.mxu0 %v260_v1  ;;  %v268_v9 = vld [vmem:[%s355_s0 + $0x8] sm:$0xff]  }
   0x7   :  { %242 = vmatpush3.bf16.msra.mxu0 %v260_v1 }
   0x8   :  { %243 = vmatprep.subr.bf16.mxu0 %v261_v2 }
   0xb   :  { %244 = vmatpush3.bf16.msra.mxu0 %v261_v2 }
   0xc   :  { %245 = vmatprep.subr.bf16.mxu0 %v262_v3 }
   0xf   :  { %246 = vmatpush3.bf16.msra.mxu0 %v262_v3 }
  0x10   :  { %247 = vmatprep.subr.bf16.mxu0 %v263_v5 }
  0x13   :  { %248 = vmatpush3.bf16.msra.mxu0 %v263_v5 }
  0x14   :  { %249 = vmatprep.subr.bf16.mxu0 %v264_v6 }
  0x17   :  { %250 = vmatpush3.bf16.msra.mxu0 %v264_v6 }
  0x18   :  { %251 = vmatprep.subr.bf16.mxu0 %v265_v7 }
  0x1b   :  { %252 = vmatpush3.bf16.msra.mxu0 %v265_v7 }
  0x1c   :  { %253 = vmatprep.subr.bf16.mxu0 %v266_v8 }
  0x1f   :  { %254 = vmatpush3.bf16.msra.mxu0 %v266_v8 }
  0x22   :  { %256 = vmatmul.mubr.bf16.vlgmr.msra.gmra.mrb[0].mxu0 %v268_v9 }
  0xf5   :  { %v257_v10 = vpop.f32.mrb[0].mxu0 }
  0xf6   :  { %v227_v11 = vpack.c.bf16 %v257_v10, %v257_v10  ;;  %v129_v12 = vpop.f32.mrb[1].mxu0  ;;  %v162_v16 = vmul.f32 %v257_v10, %v257_v10  ;;  %v148_v24 = vsel %vm144_vm1, %v257_v10, 0.0 }
  0xf7   :  { %v160_v13 = vmul.f32 %v129_v12, %v129_v12  ;;  %v225_v14 = vpack.c.bf16 %v129_v12, %v129_v12  ;;  %v258_v15 = vpop.f32.mrb[2].mxu0  ;;  %v145_v19 = vsel %vm144_vm1, %v129_v12, 0.0 }
  0xf8   :  { %197 = vst.msk [vmem:[%s356_s2 + $0x8] sm:$0xf] %vm194_vm0, %v227_v11  ;;  %v228_v17 = vpack.c.bf16 %v258_v15, %v258_v15  ;;  %v132_v18 = vpop.f32.mrb[3].mxu0  ;;  %v163_v26 = vmul.f32 %v258_v15, %v258_v15  ;;  %v167_v30 = vsel %vm144_vm1, %v162_v16, 0.0  ;;  %v150_v31 = vsel %vm144_vm1, %v258_v15, 0.0 }
  0xf9   :  { %195 = vst.msk [vmem:[%s356_s2] sm:$0xf] %vm194_vm0, %v225_v14  ;;  %v146_v20 = vsel %vm144_vm1, %v132_v18, 0.0  ;;  %v161_v21 = vmul.f32 %v132_v18, %v132_v18  ;;  %v226_v22 = vpack.c.bf16 %v132_v18, %v132_v18  ;;  %v164_v25 = vsel %vm144_vm1, %v160_v13, 0.0 }
  0xfa   :  { %198 = vst.msk [vmem:[%s356_s2 + $0xc] sm:$0xf] %vm194_vm0, %v228_v17  ;;  %v147_v23 = vadd.f32 %v146_v20, %v145_v19  ;;  %v169_v34 = vsel %vm144_vm1, %v163_v26, 0.0 }
  0xfb   :  { %v165_v27 = vsel %vm144_vm1, %v161_v21, 0.0  ;;  %196 = vst.msk [vmem:[%s356_s2 + $0x4] sm:$0xf] %vm194_vm0, %v226_v22 }
  0xfc   :  { %v149_v28 = vadd.f32 %v148_v24, %v147_v23  ;;  %v166_v29 = vadd.f32 %v165_v27, %v164_v25 }
  0xfe   :  { %v151_v32 = vadd.f32 %v150_v31, %v149_v28  ;;  %v168_v33 = vadd.f32 %v167_v30, %v166_v29 }
 0x100   :  { %v152_v35 = vrot.slane %v151_v32, 4  ;;  %v170_v36 = vadd.f32 %v169_v34, %v168_v33 }
 0x102   :  { %v153_v37 = vadd.f32 %v152_v35, %v151_v32  ;;  %v171_v38 = vrot.slane %v170_v36, 4 }
 0x104   :  { %v154_v39 = vrot.slane %v153_v37, 2  ;;  %v172_v40 = vadd.f32 %v171_v38, %v170_v36 }
 0x106   :  { %v155_v41 = vadd.f32 %v154_v39, %v153_v37  ;;  %v173_v42 = vrot.slane %v172_v40, 2 }
 0x108   :  { %v156_v43 = vrot.slane %v155_v41, 1  ;;  %v174_v44 = vadd.f32 %v173_v42, %v172_v40 }
 0x10a   :  { %v157_v45 = vadd.f32 %v156_v43, %v155_v41  ;;  %v175_v46 = vrot.slane %v174_v44, 1 }
 0x10c   :  { %159 = vst.msk [vmem:[%s357_s3] sm:$0x1] %vm158_vm2, %v157_v45  ;;  %v176_v47 = vadd.f32 %v175_v46, %v174_v44 }
 0x10e   :  { %177 = vst.msk [vmem:[%s358_s4] sm:$0x1] %vm158_vm2, %v176_v47 }

// kernel: generator_forward.14
= control target key start
LH: loop header
LB: loop body
LE: loop exit
PB: predicated region body
PF: predicated region fallthrough
CT: control target
= control target key end

     0   :  { %vm191_vm0 = vcmask 261120   ;;  %vm211_vm1 = vcmask 257024   ;;  %vm199_vm2 = vcmask 253952   ;;  %s368_s1 = inlined_call_operand.vmem [shape: bf16[256,32], index: 1, kind: input, shape index: {}]   ;;  %s369_s0 = inlined_call_operand.vmem [shape: bf16[8,256], index: 0, kind: input, shape index: {}]   ;;  %s370_s2 = inlined_call_operand.vmem [shape: bf16[8,32], index: 2, kind: output, shape index: {0}]   ;;  %s371_s3 = inlined_call_operand.vmem [shape: f32[1,1,32], index: 3, kind: output, shape index: {1}]   ;;  %s372_s4 = inlined_call_operand.vmem [shape: f32[1,1,32], index: 4, kind: output, shape index: {2}]  }
   0x1   :  { %v265_v0 = vld [vmem:[%s368_s1 + $0x40] sm:$0xff]   ;;  %v267_v2 = vld [vmem:[%s368_s1 + $0x48] sm:$0xff]   ;;  %v269_v4 = vld [vmem:[%s368_s1 + $0x50] sm:$0xff]  }
   0x2   :  { %v266_v1 = vld [vmem:[%s368_s1] sm:$0xff]   ;;  %243 = vmatprep.subr.bf16.mxu0 %v265_v0  ;;  %v268_v3 = vld [vmem:[%s368_s1 + $0x8] sm:$0xff]   ;;  %v270_v5 = vld [vmem:[%s368_s1 + $0x10] sm:$0xff]  }
   0x3   :  { %244 = vmatpush3.bf16.msra.mxu0 %v266_v1  ;;  %v271_v6 = vld [vmem:[%s368_s1 + $0x58] sm:$0xff]   ;;  %v273_v8 = vld [vmem:[%s368_s1 + $0x60] sm:$0xff]   ;;  %v275_v10 = vld [vmem:[%s368_s1 + $0x68] sm:$0xff]  }
   0x4   :  { %245 = vmatprep.subr.bf16.mxu0 %v267_v2  ;;  %v272_v7 = vld [vmem:[%s368_s1 + $0x18] sm:$0xff]   ;;  %v274_v9 = vld [vmem:[%s368_s1 + $0x20] sm:$0xff]   ;;  %v276_v13 = vld [vmem:[%s368_s1 + $0x28] sm:$0xff]  }
   0x5   :  { %v15_v11 = vld [vmem:[%s369_s0] sm:$0xff]  ;;  %v277_v14 = vld [vmem:[%s368_s1 + $0x70] sm:$0xff]   ;;  %v279_v16 = vld [vmem:[%s368_s1 + $0x78] sm:$0xff]  }
   0x6   :  { %v226_v12 = vcombine.high %v15_v11, %v15_v11  ;;  %v278_v15 = vld [vmem:[%s368_s1 + $0x30] sm:$0xff]   ;;  %v280_v17 = vld [vmem:[%s368_s1 + $0x38] sm:$0xff]   ;;  %v225_v18 = vcombine.low %v15_v11, %v15_v11 }
   0x7   :  { %246 = vmatpush3.bf16.msra.mxu0 %v268_v3 }
   0x8   :  { %247 = vmatprep.subr.bf16.mxu0 %v269_v4  ;;  %183 = vmatprep.mubr.bf16.mxu0 %v226_v12 }
   0xb   :  { %248 = vmatpush3.bf16.msra.mxu0 %v270_v5 }
   0xc   :  { %249 = vmatprep.subr.bf16.mxu0 %v271_v6 }
   0xf   :  { %250 = vmatpush3.bf16.msra.mxu0 %v272_v7 }
  0x10   :  { %251 = vmatprep.subr.bf16.mxu0 %v273_v8 }
  0x13   :  { %252 = vmatpush3.bf16.msra.mxu0 %v274_v9 }
  0x14   :  { %253 = vmatprep.subr.bf16.mxu0 %v275_v10 }
  0x17   :  { %254 = vmatpush3.bf16.msra.mxu0 %v276_v13 }
  0x18   :  { %255 = vmatprep.subr.bf16.mxu0 %v277_v14 }
  0x1b   :  { %256 = vmatpush3.bf16.msra.mxu0 %v278_v15 }
  0x1c   :  { %257 = vmatprep.subr.bf16.mxu0 %v279_v16 }
  0x1f   :  { %258 = vmatpush3.bf16.msra.mxu0 %v280_v17 }
  0x22   :  { %184 = vmatmul.mubr.bf16.vlgmr.msra.gmra.mrb[0].mxu0 %v225_v18 }
  0xf5   :  { %v259_v19 = vpop.f32.mrb[0].mxu0 }
  0xf6   :  { %v260_v20 = vpop.f32.mrb[1].mxu0 }
  0xf7   :  { %v261_v21 = vadd.f32 %v260_v20, %v259_v19  ;;  %v262_v22 = vpop.f32.mrb[2].mxu0 }
  0xf8   :  { %v263_v23 = vpop.f32.mrb[3].mxu0 }
  0xf9   :  { %v192_v24 = vsel %vm191_vm0, %v261_v21, 0.0  ;;  %v201_v25 = vmul.f32 %v261_v21, %v261_v21  ;;  %v210_v26 = vpack.c.bf16 %v261_v21, %v261_v21 }
  0xfa   :  { %v193_v27 = vrot.slane %v192_v24, 4 }
  0xfb   :  { %v202_v28 = vsel %vm191_vm0, %v201_v25, 0.0  ;;  %212 = vst.msk [vmem:[%s370_s2] sm:$0xf] %vm211_vm1, %v210_v26 }
  0xfc   :  { %v194_v29 = vadd.f32 %v193_v27, %v192_v24  ;;  %v203_v30 = vrot.slane %v202_v28, 4 }
  0xfe   :  { %v195_v31 = vrot.slane %v194_v29, 2  ;;  %v204_v32 = vadd.f32 %v203_v30, %v202_v28 }
 0x100   :  { %v196_v33 = vadd.f32 %v195_v31, %v194_v29  ;;  %v205_v34 = vrot.slane %v204_v32, 2 }
 0x102   :  { %v197_v35 = vrot.slane %v196_v33, 1  ;;  %v206_v36 = vadd.f32 %v205_v34, %v204_v32 }
 0x104   :  { %v198_v37 = vadd.f32 %v197_v35, %v196_v33  ;;  %v207_v38 = vrot.slane %v206_v36, 1 }
 0x106   :  { %200 = vst.msk [vmem:[%s371_s3] sm:$0x1] %vm199_vm2, %v198_v37  ;;  %v208_v39 = vadd.f32 %v207_v38, %v206_v36 }
 0x108   :  { %209 = vst.msk [vmem:[%s372_s4] sm:$0x1] %vm199_vm2, %v208_v39 }

// kernel: generator_forward.20
= control target key start
LH: loop header
LB: loop body
LE: loop exit
PB: predicated region body
PF: predicated region fallthrough
CT: control target
= control target key end

     0   :  { %vm61_vm0 = vcmask 257024   ;;  %s127_s0 = inlined_call_operand.vmem [shape: bf16[8,32], index: 0, kind: input, shape index: {}]   ;;  %s128_s1 = inlined_call_operand.vmem [shape: f32[1,32], index: 1, kind: input, shape index: {}]   ;;  %s129_s2 = inlined_call_operand.vmem [shape: f32[1,32], index: 2, kind: input, shape index: {}]   ;;  %s130_s3 = inlined_call_operand.vmem [shape: bf16[8,32], index: 3, kind: input, shape index: {}]   ;;  %s131_s4 = inlined_call_operand.vmem [shape: f32[1,32], index: 4, kind: input, shape index: {}]   ;;  %s132_s5 = inlined_call_operand.vmem [shape: f32[1,32], index: 5, kind: input, shape index: {}]   ;;  %s133_s6 = inlined_call_operand.vmem [shape: bf16[8,32], index: 6, kind: output, shape index: {}]  }
   0x1   :  { %v23_v0 = vld [vmem:[%s127_s0] sm:$0xf] }
   0x2   :  { %v67_v1 = vld [vmem:[%s128_s1] ss:$0 sm:$0xff]  ;;  %v24_v2 = vunpack.c.l.bf16 %v23_v0 }
   0x3   :  { %v41_v3 = vld [vmem:[%s130_s3] sm:$0xf] }
   0x4   :  { %v69_v4 = vld [vmem:[%s131_s4] ss:$0 sm:$0xff]  ;;  %v42_v6 = vunpack.c.l.bf16 %v41_v3  ;;  %v32_v7 = vmul.f32 %v67_v1, %v24_v2 }
   0x5   :  { %v68_v5 = vld [vmem:[%s129_s2] ss:$0 sm:$0xff] }
   0x6   :  { %v70_v8 = vld [vmem:[%s132_s5] ss:$0 sm:$0xff]  ;;  %v50_v9 = vmul.f32 %v69_v4, %v42_v6  ;;  %v40_v10 = vadd.f32 %v68_v5, %v32_v7 }
   0x8   :  { %v58_v11 = vadd.f32 %v70_v8, %v50_v9 }
   0xa   :  { %v59_v12 = vadd.f32 %v58_v11, %v40_v10 }
   0xc   :  { %v60_v13 = vpack.c.bf16 %v59_v12, %v59_v12 }
   0xe   :  { %62 = vst.msk [vmem:[%s133_s6] sm:$0xf] %vm61_vm0, %v60_v13 }

// kernel: generator_forward.15
= control target key start
LH: loop header
LB: loop body
LE: loop exit
PB: predicated region body
PF: predicated region fallthrough
CT: control target
= control target key end

     0   :  { %v366_v1 = vmov 0.0   ;;  %vm367_vm0 = vmmov 0   ;;  %vm171_vm1 = vcmask 261120   ;;  %vm274_vm2 = vcmask 257024   ;;  %s465_s1 = inlined_call_operand.vmem [shape: bf16[288,32], index: 1, kind: input, shape index: {}]   ;;  %s466_s0 = inlined_call_operand.vmem [shape: bf16[8,288], index: 0, kind: input, shape index: {}]   ;;  %s467_s2 = inlined_call_operand.vmem [shape: bf16[8,32], index: 2, kind: output, shape index: {0}]   ;;  %s468_s3 = inlined_call_operand.vmem [shape: f32[1,1,32], index: 3, kind: output, shape index: {1}]   ;;  %s469_s4 = inlined_call_operand.vmem [shape: f32[1,1,32], index: 4, kind: output, shape index: {2}]  }
   0x1   :  { %v345_v0 = vld [vmem:[%s465_s1 + $0x40] sm:$0xff]   ;;  %335 = vmatprep.subr.bf16.mxu1 %v366_v1  ;;  %339 = vmatprep.mubr.msk.bf16.mxu1 %vm367_vm0, %v366_v1  ;;  %v347_v3 = vld [vmem:[%s465_s1 + $0x48] sm:$0xff]   ;;  %v349_v5 = vld [vmem:[%s465_s1 + $0x50] sm:$0xff]   ;;  %vm262_vm3 = vcmask 253952  }
   0x2   :  { %v346_v2 = vld [vmem:[%s465_s1] sm:$0xff]   ;;  %310 = vmatprep.subr.bf16.mxu0 %v345_v0  ;;  %v348_v4 = vld [vmem:[%s465_s1 + $0x8] sm:$0xff]   ;;  %v350_v6 = vld [vmem:[%s465_s1 + $0x10] sm:$0xff]  }
   0x3   :  { %311 = vmatpush3.bf16.msra.mxu0 %v346_v2  ;;  %v351_v7 = vld [vmem:[%s465_s1 + $0x58] sm:$0xff]   ;;  %v353_v9 = vld [vmem:[%s465_s1 + $0x60] sm:$0xff]   ;;  %v355_v12 = vld [vmem:[%s465_s1 + $0x68] sm:$0xff]  }
   0x4   :  { %312 = vmatprep.subr.bf16.mxu0 %v347_v3  ;;  %v352_v8 = vld [vmem:[%s465_s1 + $0x18] sm:$0xff]   ;;  %v359_v10 = vld [vmem:[%s465_s1 + $0x80] sm:$0xff]   ;;  %v362_v13 = vld [vmem:[%s465_s1 + $0x88] sm:$0xff]  }
   0x5   :  { %v354_v11 = vld [vmem:[%s465_s1 + $0x20] sm:$0xff]   ;;  %336 = vmatpush3.bf16.msra.mxu1 %v359_v10  ;;  %v356_v15 = vld [vmem:[%s465_s1 + $0x28] sm:$0xff]   ;;  %v357_v18 = vld [vmem:[%s465_s1 + $0x70] sm:$0xff]  }
   0x6   :  { %337 = vmatprep.subr.bf16.mxu1 %v366_v1  ;;  %v15_v14 = vld [vmem:[%s466_s0] sm:$0xff]  ;;  %v365_v17 = vld [vmem:[%s466_s0 + $0x8] ss:$0 sps:$4 sm:$0xff]   ;;  %v358_v19 = vld [vmem:[%s465_s1 + $0x30] sm:$0xff]  }
   0x7   :  { %313 = vmatpush3.bf16.msra.mxu0 %v348_v4  ;;  %v289_v16 = vcombine.high %v15_v14, %v15_v14  ;;  %v360_v20 = vld [vmem:[%s465_s1 + $0x78] sm:$0xff]   ;;  %v288_v22 = vcombine.low %v15_v14, %v15_v14 }
   0x8   :  { %314 = vmatprep.subr.bf16.mxu0 %v349_v5  ;;  %v361_v21 = vld [vmem:[%s465_s1 + $0x38] sm:$0xff]  }
   0x9   :  { %338 = vmatpush3.bf16.msra.mxu1 %v362_v13  ;;  %207 = vmatprep.mubr.bf16.mxu0 %v289_v16 }
   0xb   :  { %315 = vmatpush3.bf16.msra.mxu0 %v350_v6 }
   0xc   :  { %316 = vmatprep.subr.bf16.mxu0 %v351_v7  ;;  %340 = vmatmul.mubr.msk.bf16.vlgmr.msra.gmra.mrb[0].mxu1 %vm171_vm1, %v365_v17 }
   0xf   :  { %317 = vmatpush3.bf16.msra.mxu0 %v352_v8 }
  0x10   :  { %318 = vmatprep.subr.bf16.mxu0 %v353_v9 }
  0x13   :  { %319 = vmatpush3.bf16.msra.mxu0 %v354_v11 }
  0x14   :  { %320 = vmatprep.subr.bf16.mxu0 %v355_v12 }
  0x17   :  { %321 = vmatpush3.bf16.msra.mxu0 %v356_v15 }
  0x18   :  { %322 = vmatprep.subr.bf16.mxu0 %v357_v18 }
  0x1b   :  { %323 = vmatpush3.bf16.msra.mxu0 %v358_v19 }
  0x1c   :  { %324 = vmatprep.subr.bf16.mxu0 %v360_v20 }
  0x1f   :  { %325 = vmatpush3.bf16.msra.mxu0 %v361_v21 }
  0x22   :  { %208 = vmatmul.mubr.bf16.vlgmr.msra.gmra.mrb[0].mxu0 %v288_v22 }
  0xdf   :  { %v249_v23 = vpop.f32.mrb[0].mxu1 }
  0xe0   :  { %v341_v24 = vpop.f32.mrb[1].mxu1 }
  0xe1   :  { %v252_v25 = vpop.f32.mrb[2].mxu1 }
  0xe2   :  { %v342_v26 = vpop.f32.mrb[3].mxu1 }
  0xf5   :  { %v326_v27 = vpop.f32.mrb[0].mxu0 }
  0xf6   :  { %v327_v28 = vpop.f32.mrb[1].mxu0 }
  0xf7   :  { %v328_v29 = vadd.f32 %v327_v28, %v326_v27  ;;  %v329_v30 = vpop.f32.mrb[2].mxu0 }
  0xf8   :  { %v330_v31 = vpop.f32.mrb[3].mxu0 }
  0xf9   :  { %v250_v32 = vadd.f32 %v328_v29, %v249_v23 }
  0xfb   :  { %v255_v33 = vsel %vm171_vm1, %v250_v32, 0.0  ;;  %v264_v34 = vmul.f32 %v250_v32, %v250_v32  ;;  %v273_v35 = vpack.c.bf16 %v250_v32, %v250_v32 }
  0xfc   :  { %v256_v36 = vrot.slane %v255_v33, 4 }
  0xfd   :  { %v265_v37 = vsel %vm171_vm1, %v264_v34, 0.0  ;;  %275 = vst.msk [vmem:[%s467_s2] sm:$0xf] %vm274_vm2, %v273_v35 }
  0xfe   :  { %v257_v38 = vadd.f32 %v256_v36, %v255_v33  ;;  %v266_v39 = vrot.slane %v265_v37, 4 }
 0x100   :  { %v258_v40 = vrot.slane %v257_v38, 2  ;;  %v267_v41 = vadd.f32 %v266_v39, %v265_v37 }
 0x102   :  { %v259_v42 = vadd.f32 %v258_v40, %v257_v38  ;;  %v268_v43 = vrot.slane %v267_v41, 2 }
 0x104   :  { %v260_v44 = vrot.slane %v259_v42, 1  ;;  %v269_v45 = vadd.f32 %v268_v43, %v267_v41 }
 0x106   :  { %v261_v46 = vadd.f32 %v260_v44, %v259_v42  ;;  %v270_v47 = vrot.slane %v269_v45, 1 }
 0x108   :  { %263 = vst.msk [vmem:[%s468_s3] sm:$0x1] %vm262_vm3, %v261_v46  ;;  %v271_v48 = vadd.f32 %v270_v47, %v269_v45 }
 0x10a   :  { %272 = vst.msk [vmem:[%s469_s4] sm:$0x1] %vm262_vm3, %v271_v48 }

// kernel: generator_forward.17
= control target key start
LH: loop header
LB: loop body
LE: loop exit
PB: predicated region body
PF: predicated region fallthrough
CT: control target
= control target key end

     0   :  { %vm62_vm0 = vcmask 257024   ;;  %s128_s0 = inlined_call_operand.vmem [shape: bf16[8,32], index: 0, kind: input, shape index: {}]   ;;  %s129_s1 = inlined_call_operand.vmem [shape: f32[1,32], index: 1, kind: input, shape index: {}]   ;;  %s130_s3 = inlined_call_operand.vmem [shape: bf16[8,32], index: 3, kind: input, shape index: {}]   ;;  %s131_s4 = inlined_call_operand.vmem [shape: f32[1,32], index: 4, kind: input, shape index: {}]   ;;  %s132_s2 = inlined_call_operand.vmem [shape: f32[1,32], index: 2, kind: input, shape index: {}]   ;;  %s133_s5 = inlined_call_operand.vmem [shape: f32[1,32], index: 5, kind: input, shape index: {}]   ;;  %s134_s6 = inlined_call_operand.vmem [shape: bf16[8,32], index: 6, kind: output, shape index: {}]  }
   0x1   :  { %v23_v0 = vld [vmem:[%s128_s0] sm:$0xf] }
   0x2   :  { %v68_v1 = vld [vmem:[%s129_s1] ss:$0 sm:$0xff]  ;;  %v24_v2 = vunpack.c.l.bf16 %v23_v0 }
   0x3   :  { %v41_v3 = vld [vmem:[%s130_s3] sm:$0xf] }
   0x4   :  { %v70_v4 = vld [vmem:[%s131_s4] ss:$0 sm:$0xff]  ;;  %v42_v5 = vunpack.c.l.bf16 %v41_v3  ;;  %v32_v6 = vmul.f32 %v68_v1, %v24_v2 }
   0x5   :  { %v69_v7 = vld [vmem:[%s132_s2] ss:$0 sm:$0xff] }
   0x6   :  { %v71_v8 = vld [vmem:[%s133_s5] ss:$0 sm:$0xff]  ;;  %v50_v9 = vmul.f32 %v70_v4, %v42_v5  ;;  %v40_v10 = vadd.f32 %v69_v7, %v32_v6 }
   0x8   :  { %v58_v11 = vadd.f32 %v71_v8, %v50_v9 }
   0xa   :  { %v59_v12 = vmax.f32 %v58_v11, 0.0 }
   0xc   :  { %v60_v13 = vadd.f32 %v59_v12, %v40_v10 }
   0xe   :  { %v61_v14 = vpack.c.bf16 %v60_v13, %v60_v13 }
  0x10   :  { %63 = vst.msk [vmem:[%s134_s6] sm:$0xf] %vm62_vm0, %v61_v14 }

// kernel: generator_forward.21
= control target key start
LH: loop header
LB: loop body
LE: loop exit
PB: predicated region body
PF: predicated region fallthrough
CT: control target
= control target key end

     0   :  { %v367_v1 = vmov 0.0   ;;  %vm368_vm0 = vmmov 0   ;;  %vm171_vm1 = vcmask 261120   ;;  %vm255_vm2 = vcmask 523264   ;;  %s463_s1 = inlined_call_operand.vmem [shape: bf16[288,64], index: 1, kind: input, shape index: {}]   ;;  %s464_s0 = inlined_call_operand.vmem [shape: bf16[8,288], index: 0, kind: input, shape index: {}]   ;;  %s465_s2 = inlined_call_operand.vmem [shape: bf16[8,64], index: 2, kind: output, shape index: {0}]   ;;  %s466_s3 = inlined_call_operand.vmem [shape: f32[1,1,64], index: 3, kind: output, shape index: {1}]   ;;  %s467_s4 = inlined_call_operand.vmem [shape: f32[1,1,64], index: 4, kind: output, shape index: {2}]  }
   0x1   :  { %v346_v0 = vld [vmem:[%s463_s1 + $0x40] sm:$0xff]   ;;  %336 = vmatprep.subr.bf16.mxu1 %v367_v1  ;;  %340 = vmatprep.mubr.msk.bf16.mxu1 %vm368_vm0, %v367_v1  ;;  %v348_v3 = vld [vmem:[%s463_s1 + $0x48] sm:$0xff]   ;;  %v350_v5 = vld [vmem:[%s463_s1 + $0x50] sm:$0xff]   ;;  %vm275_vm3 = vcmask 519168   ;;  %vm263_vm4 = vcmask 516096  }
   0x2   :  { %v347_v2 = vld [vmem:[%s463_s1] sm:$0xff]   ;;  %311 = vmatprep.subr.bf16.mxu0 %v346_v0  ;;  %v349_v4 = vld [vmem:[%s463_s1 + $0x8] sm:$0xff]   ;;  %v351_v6 = vld [vmem:[%s463_s1 + $0x10] sm:$0xff]  }
   0x3   :  { %312 = vmatpush3.bf16.msra.mxu0 %v347_v2  ;;  %v352_v7 = vld [vmem:[%s463_s1 + $0x58] sm:$0xff]   ;;  %v354_v9 = vld [vmem:[%s463_s1 + $0x60] sm:$0xff]   ;;  %v356_v12 = vld [vmem:[%s463_s1 + $0x68] sm:$0xff]  }
   0x4   :  { %313 = vmatprep.subr.bf16.mxu0 %v348_v3  ;;  %v353_v8 = vld [vmem:[%s463_s1 + $0x18] sm:$0xff]   ;;  %v360_v10 = vld [vmem:[%s463_s1 + $0x80] sm:$0xff]   ;;  %v363_v13 = vld [vmem:[%s463_s1 + $0x88] sm:$0xff]  }
   0x5   :  { %v355_v11 = vld [vmem:[%s463_s1 + $0x20] sm:$0xff]   ;;  %337 = vmatpush3.bf16.msra.mxu1 %v360_v10  ;;  %v357_v15 = vld [vmem:[%s463_s1 + $0x28] sm:$0xff]   ;;  %v358_v18 = vld [vmem:[%s463_s1 + $0x70] sm:$0xff]  }
   0x6   :  { %338 = vmatprep.subr.bf16.mxu1 %v367_v1  ;;  %v15_v14 = vld [vmem:[%s464_s0] sm:$0xff]  ;;  %v366_v17 = vld [vmem:[%s464_s0 + $0x8] ss:$0 sps:$4 sm:$0xff]   ;;  %v359_v19 = vld [vmem:[%s463_s1 + $0x30] sm:$0xff]  }
   0x7   :  { %314 = vmatpush3.bf16.msra.mxu0 %v349_v4  ;;  %v290_v16 = vcombine.high %v15_v14, %v15_v14  ;;  %v361_v20 = vld [vmem:[%s463_s1 + $0x78] sm:$0xff]   ;;  %v289_v22 = vcombine.low %v15_v14, %v15_v14 }
   0x8   :  { %315 = vmatprep.subr.bf16.mxu0 %v350_v5  ;;  %v362_v21 = vld [vmem:[%s463_s1 + $0x38] sm:$0xff]  }
   0x9   :  { %339 = vmatpush3.bf16.msra.mxu1 %v363_v13  ;;  %207 = vmatprep.mubr.bf16.mxu0 %v290_v16 }
   0xb   :  { %316 = vmatpush3.bf16.msra.mxu0 %v351_v6 }
   0xc   :  { %317 = vmatprep.subr.bf16.mxu0 %v352_v7  ;;  %341 = vmatmul.mubr.msk.bf16.vlgmr.msra.gmra.mrb[0].mxu1 %vm171_vm1, %v366_v17 }
   0xf   :  { %318 = vmatpush3.bf16.msra.mxu0 %v353_v8 }
  0x10   :  { %319 = vmatprep.subr.bf16.mxu0 %v354_v9 }
  0x13   :  { %320 = vmatpush3.bf16.msra.mxu0 %v355_v11 }
  0x14   :  { %321 = vmatprep.subr.bf16.mxu0 %v356_v12 }
  0x17   :  { %322 = vmatpush3.bf16.msra.mxu0 %v357_v15 }
  0x18   :  { %323 = vmatprep.subr.bf16.mxu0 %v358_v18 }
  0x1b   :  { %324 = vmatpush3.bf16.msra.mxu0 %v359_v19 }
  0x1c   :  { %325 = vmatprep.subr.bf16.mxu0 %v361_v20 }
  0x1f   :  { %326 = vmatpush3.bf16.msra.mxu0 %v362_v21 }
  0x22   :  { %208 = vmatmul.mubr.bf16.vlgmr.msra.gmra.mrb[0].mxu0 %v289_v22 }
  0xdf   :  { %v249_v23 = vpop.f32.mrb[0].mxu1 }
  0xe0   :  { %v342_v24 = vpop.f32.mrb[1].mxu1 }
  0xe1   :  { %v252_v25 = vpop.f32.mrb[2].mxu1 }
  0xe2   :  { %v343_v26 = vpop.f32.mrb[3].mxu1 }
  0xf5   :  { %v327_v27 = vpop.f32.mrb[0].mxu0 }
  0xf6   :  { %v328_v28 = vpop.f32.mrb[1].mxu0 }
  0xf7   :  { %v329_v29 = vadd.f32 %v328_v28, %v327_v27  ;;  %v330_v30 = vpop.f32.mrb[2].mxu0 }
  0xf8   :  { %v331_v31 = vpop.f32.mrb[3].mxu0 }
  0xf9   :  { %v250_v32 = vadd.f32 %v329_v29, %v249_v23 }
  0xfb   :  { %v256_v33 = vsel %vm255_vm2, %v250_v32, 0.0  ;;  %v265_v34 = vmul.f32 %v250_v32, %v250_v32  ;;  %v274_v35 = vpack.c.bf16 %v250_v32, %v250_v32 }
  0xfc   :  { %v257_v36 = vrot.slane %v256_v33, 4 }
  0xfd   :  { %v266_v37 = vsel %vm255_vm2, %v265_v34, 0.0  ;;  %276 = vst.msk [vmem:[%s465_s2] sm:$0xf] %vm275_vm3, %v274_v35 }
  0xfe   :  { %v258_v38 = vadd.f32 %v257_v36, %v256_v33  ;;  %v267_v39 = vrot.slane %v266_v37, 4 }
 0x100   :  { %v259_v40 = vrot.slane %v258_v38, 2  ;;  %v268_v41 = vadd.f32 %v267_v39, %v266_v37 }
 0x102   :  { %v260_v42 = vadd.f32 %v259_v40, %v258_v38  ;;  %v269_v43 = vrot.slane %v268_v41, 2 }
 0x104   :  { %v261_v44 = vrot.slane %v260_v42, 1  ;;  %v270_v45 = vadd.f32 %v269_v43, %v268_v41 }
 0x106   :  { %v262_v46 = vadd.f32 %v261_v44, %v260_v42  ;;  %v271_v47 = vrot.slane %v270_v45, 1 }
 0x108   :  { %264 = vst.msk [vmem:[%s466_s3] sm:$0x1] %vm263_vm4, %v262_v46  ;;  %v272_v48 = vadd.f32 %v271_v47, %v270_v45 }
 0x10a   :  { %273 = vst.msk [vmem:[%s467_s4] sm:$0x1] %vm263_vm4, %v272_v48 }

// kernel: generator_forward.22
= control target key start
LH: loop header
LB: loop body
LE: loop exit
PB: predicated region body
PF: predicated region fallthrough
CT: control target
= control target key end

     0   :  { %v289_v0 = vmov 0   ;;  %vm109_vm0 = vcmask 130048   ;;  %vm165_vm1 = vcmask 261120   ;;  %vm215_vm2 = vcmask 257024   ;;  %s384_s1 = inlined_call_operand.vmem [shape: bf16[144,32], index: 1, kind: input, shape index: {}]   ;;  %s385_s0 = inlined_call_operand.vmem [shape: bf16[32,144], index: 0, kind: input, shape index: {}]   ;;  %s386_s2 = inlined_call_operand.vmem [shape: bf16[32,32], index: 2, kind: output, shape index: {0}]   ;;  %s387_s3 = inlined_call_operand.vmem [shape: f32[1,1,32], index: 3, kind: output, shape index: {1}]   ;;  %s388_s4 = inlined_call_operand.vmem [shape: f32[1,1,32], index: 4, kind: output, shape index: {2}]  }
   0x1   :  { %116 = vmatprep.subr.bf16.mxu0 %v289_v0  ;;  %255 = vmatprep.subr.bf16.mxu1 %v289_v0  ;;  %v274_v1 = vld [vmem:[%s384_s1] sm:$0xff]   ;;  %v275_v2 = vld [vmem:[%s384_s1 + $0x8] sm:$0xff]   ;;  %v276_v3 = vld [vmem:[%s384_s1 + $0x10] sm:$0xff]   ;;  %vm179_vm3 = vcmask 253952  }
   0x2   :  { %117 = vmatpush1.bf16.msra.mxu0 %v274_v1  ;;  %264 = vmatpush1.bf16.msra.mxu1 %v274_v1  ;;  %v277_v4 = vld [vmem:[%s384_s1 + $0x18] sm:$0xff]   ;;  %v285_v5 = vld [vmem:[%s385_s0 + $0x4] ss:$8 sps:$4 sm:$0xff]   ;;  %v280_v9 = vld [vmem:[%s384_s1 + $0x30] sm:$0xff]  }
   0x3   :  { %118 = vmatprep.subr.bf16.mxu0 %v289_v0  ;;  %256 = vmatprep.subr.bf16.mxu1 %v289_v0  ;;  %v288_v6 = vld [vmem:[%s385_s0 + $0x14] ss:$8 sps:$4 sm:$0xff]   ;;  %v278_v7 = vld [vmem:[%s384_s1 + $0x20] sm:$0xff]   ;;  %v279_v8 = vld [vmem:[%s384_s1 + $0x28] sm:$0xff]  }
   0x4   :  { %245 = vmatprep.mubr.msk.bf16.mxu0 %vm109_vm0, %v285_v5  ;;  %246 = vmatprep.mubr.msk.bf16.mxu1 %vm109_vm0, %v288_v6  ;;  %v281_v10 = vld [vmem:[%s384_s1 + $0x38] sm:$0xff]   ;;  %v282_v11 = vld [vmem:[%s384_s1 + $0x40] sm:$0xff]  }
   0x5   :  { %v283_v12 = vld [vmem:[%s385_s0] ss:$8 sps:$4 sm:$0xff]   ;;  %v286_v13 = vld [vmem:[%s385_s0 + $0x10] ss:$8 sps:$4 sm:$0xff]  }
   0x6   :  { %119 = vmatpush1.bf16.msra.mxu0 %v275_v2  ;;  %265 = vmatpush1.bf16.msra.mxu1 %v275_v2 }
   0x7   :  { %120 = vmatprep.subr.bf16.mxu0 %v289_v0  ;;  %257 = vmatprep.subr.bf16.mxu1 %v289_v0 }
   0xa   :  { %121 = vmatpush1.bf16.msra.mxu0 %v276_v3  ;;  %266 = vmatpush1.bf16.msra.mxu1 %v276_v3 }
   0xb   :  { %122 = vmatprep.subr.bf16.mxu0 %v289_v0  ;;  %258 = vmatprep.subr.bf16.mxu1 %v289_v0 }
   0xe   :  { %123 = vmatpush1.bf16.msra.mxu0 %v277_v4  ;;  %267 = vmatpush1.bf16.msra.mxu1 %v277_v4 }
   0xf   :  { %124 = vmatprep.subr.bf16.mxu0 %v289_v0  ;;  %259 = vmatprep.subr.bf16.mxu1 %v289_v0 }
  0x12   :  { %125 = vmatpush1.bf16.msra.mxu0 %v278_v7  ;;  %268 = vmatpush1.bf16.msra.mxu1 %v278_v7 }
  0x13   :  { %126 = vmatprep.subr.bf16.mxu0 %v289_v0  ;;  %260 = vmatprep.subr.bf16.mxu1 %v289_v0 }
  0x16   :  { %127 = vmatpush1.bf16.msra.mxu0 %v279_v8  ;;  %269 = vmatpush1.bf16.msra.mxu1 %v279_v8 }
  0x17   :  { %128 = vmatprep.subr.bf16.mxu0 %v289_v0  ;;  %261 = vmatprep.subr.bf16.mxu1 %v289_v0 }
  0x1a   :  { %129 = vmatpush1.bf16.msra.mxu0 %v280_v9  ;;  %270 = vmatpush1.bf16.msra.mxu1 %v280_v9 }
  0x1b   :  { %130 = vmatprep.subr.bf16.mxu0 %v289_v0  ;;  %262 = vmatprep.subr.bf16.mxu1 %v289_v0 }
  0x1e   :  { %131 = vmatpush1.bf16.msra.mxu0 %v281_v10  ;;  %271 = vmatpush1.bf16.msra.mxu1 %v281_v10 }
  0x1f   :  { %132 = vmatprep.subr.bf16.mxu0 %v289_v0  ;;  %263 = vmatprep.subr.bf16.mxu1 %v289_v0 }
  0x22   :  { %133 = vmatpush1.bf16.msra.mxu0 %v282_v11  ;;  %272 = vmatpush1.bf16.msra.mxu1 %v282_v11 }
  0x25   :  { %149 = vmatmul.mubr.bf16.vlgmr.msra.gmra.mrb[0].mxu0 %v283_v12  ;;  %157 = vmatmul.mubr.bf16.vlgmr.msra.gmra.mrb[0].mxu1 %v286_v13 }
  0xf8   :  { %v150_v14 = vpop.f32.mrb[0].mxu0  ;;  %v158_v15 = vpop.f32.mrb[0].mxu1 }
  0xf9   :  { %v181_v16 = vmul.f32 %v150_v14, %v150_v14  ;;  %v251_v17 = vpack.c.bf16 %v150_v14, %v150_v14  ;;  %v152_v18 = vpop.f32.mrb[1].mxu0  ;;  %v160_v19 = vpop.f32.mrb[1].mxu1  ;;  %v166_v20 = vsel %vm165_vm1, %v150_v14, 0.0  ;;  %v183_v21 = vmul.f32 %v158_v15, %v158_v15 }
  0xfa   :  { %v253_v22 = vpack.c.bf16 %v158_v15, %v158_v15  ;;  %v153_v23 = vpop.f32.mrb[2].mxu0  ;;  %v161_v24 = vpop.f32.mrb[2].mxu1  ;;  %v169_v25 = vsel %vm165_vm1, %v158_v15, 0.0 }
  0xfb   :  { %216 = vst.msk [vmem:[%s386_s2] sm:$0xf] %vm215_vm2, %v251_v17  ;;  %v167_v26 = vsel %vm165_vm1, %v153_v23, 0.0  ;;  %v182_v27 = vmul.f32 %v153_v23, %v153_v23  ;;  %v252_v28 = vpack.c.bf16 %v153_v23, %v153_v23  ;;  %v155_v29 = vpop.f32.mrb[3].mxu0  ;;  %v163_v30 = vpop.f32.mrb[3].mxu1  ;;  %v185_v31 = vsel %vm165_vm1, %v181_v16, 0.0 }
  0xfc   :  { %218 = vst.msk [vmem:[%s386_s2 + $0x8] sm:$0xf] %vm215_vm2, %v253_v22  ;;  %v168_v32 = vadd.f32 %v167_v26, %v166_v20  ;;  %v188_v33 = vsel %vm165_vm1, %v183_v21, 0.0  ;;  %v184_v35 = vmul.f32 %v161_v24, %v161_v24  ;;  %v254_v36 = vpack.c.bf16 %v161_v24, %v161_v24 }
  0xfd   :  { %v186_v34 = vsel %vm165_vm1, %v182_v27, 0.0  ;;  %217 = vst.msk [vmem:[%s386_s2 + $0x4] sm:$0xf] %vm215_vm2, %v252_v28  ;;  %v171_v39 = vsel %vm165_vm1, %v161_v24, 0.0 }
  0xfe   :  { %v187_v37 = vadd.f32 %v186_v34, %v185_v31  ;;  %v170_v38 = vadd.f32 %v169_v25, %v168_v32  ;;  %219 = vst.msk [vmem:[%s386_s2 + $0xc] sm:$0xf] %vm215_vm2, %v254_v36  ;;  %v190_v42 = vsel %vm165_vm1, %v184_v35, 0.0 }
 0x100   :  { %v172_v40 = vadd.f32 %v171_v39, %v170_v38  ;;  %v189_v41 = vadd.f32 %v188_v33, %v187_v37 }
 0x102   :  { %v173_v43 = vrot.slane %v172_v40, 4  ;;  %v191_v44 = vadd.f32 %v190_v42, %v189_v41 }
 0x104   :  { %v174_v45 = vadd.f32 %v173_v43, %v172_v40  ;;  %v192_v46 = vrot.slane %v191_v44, 4 }
 0x106   :  { %v175_v47 = vrot.slane %v174_v45, 2  ;;  %v193_v48 = vadd.f32 %v192_v46, %v191_v44 }
 0x108   :  { %v176_v49 = vadd.f32 %v175_v47, %v174_v45  ;;  %v194_v50 = vrot.slane %v193_v48, 2 }
 0x10a   :  { %v177_v51 = vrot.slane %v176_v49, 1  ;;  %v195_v52 = vadd.f32 %v194_v50, %v193_v48 }
 0x10c   :  { %v178_v53 = vadd.f32 %v177_v51, %v176_v49  ;;  %v196_v54 = vrot.slane %v195_v52, 1 }
 0x10e   :  { %180 = vst.msk [vmem:[%s387_s3] sm:$0x1] %vm179_vm3, %v178_v53  ;;  %v197_v55 = vadd.f32 %v196_v54, %v195_v52 }
 0x110   :  { %198 = vst.msk [vmem:[%s388_s4] sm:$0x1] %vm179_vm3, %v197_v55 }

// kernel: generator_forward.23
= control target key start
LH: loop header
LB: loop body
LE: loop exit
PB: predicated region body
PF: predicated region fallthrough
CT: control target
= control target key end

     0   :  { %vm104_vm0 = vcmask 588800   ;;  %vm129_vm1 = vcmask 1043456   ;;  %vm310_vm2 = vcmask 93184   ;;  %s606_s1 = inlined_call_operand.vmem [shape: bf16[72,12], index: 1, kind: input, shape index: {}]   ;;  %s607_s0 = inlined_call_operand.vmem [shape: bf16[128,72], index: 0, kind: input, shape index: {}]   ;;  %s608_s2 = inlined_call_operand.vmem [shape: bf16[128,12], index: 2, kind: output, shape index: {}]  }
   0x1   :  { %v435_v0 = vld [vmem:[%s606_s1] sm:$0xff]   ;;  %v436_v1 = vld [vmem:[%s606_s1 + $0x8] sm:$0xff]   ;;  %v437_v2 = vld [vmem:[%s606_s1 + $0x10] sm:$0xff]  }
   0x2   :  { %397 = vmatprep.subr.bf16.mxu0 %v435_v0  ;;  %423 = vmatprep.subr.bf16.mxu1 %v435_v0  ;;  %v440_v3 = vld [vmem:[%s607_s0] sm:$0xff]   ;;  %v438_v5 = vld [vmem:[%s606_s1 + $0x18] sm:$0xff]   ;;  %v442_v8 = vld [vmem:[%s607_s0 + $0x8] sm:$0xff]  }
   0x3   :  { %398 = vmatpush3.bf16.msra.mxu0 %v435_v0  ;;  %428 = vmatpush3.bf16.msra.mxu1 %v435_v0  ;;  %v441_v4 = vld [vmem:[%s607_s0 + $0x20] sm:$0xff]   ;;  %v443_v9 = vld [vmem:[%s607_s0 + $0x28] sm:$0xff]   ;;  %v444_v10 = vld [vmem:[%s607_s0 + $0x10] sm:$0xff]  }
   0x4   :  { %399 = vmatprep.subr.bf16.mxu0 %v436_v1  ;;  %424 = vmatprep.subr.bf16.mxu1 %v436_v1  ;;  %v439_v6 = vld [vmem:[%s606_s1 + $0x20] ss:$0 sps:$4 sm:$0xff]   ;;  %v445_v11 = vld [vmem:[%s607_s0 + $0x30] sm:$0xff]   ;;  %v446_v12 = vld [vmem:[%s607_s0 + $0x18] sm:$0xff]  }
   0x5   :  { %407 = vmatprep.mubr.msk.bf16.mxu0 %vm104_vm0, %v440_v3  ;;  %415 = vmatprep.mubr.msk.bf16.mxu1 %vm104_vm0, %v441_v4  ;;  %v131_v7 = vsel %vm129_vm1, %v439_v6, 0  ;;  %v447_v13 = vld [vmem:[%s607_s0 + $0x38] sm:$0xff]  }
   0x7   :  { %400 = vmatpush3.bf16.msra.mxu0 %v436_v1  ;;  %429 = vmatpush3.bf16.msra.mxu1 %v436_v1 }
   0x8   :  { %401 = vmatprep.subr.bf16.mxu0 %v437_v2  ;;  %425 = vmatprep.subr.bf16.mxu1 %v437_v2 }
   0xb   :  { %402 = vmatpush3.bf16.msra.mxu0 %v437_v2  ;;  %430 = vmatpush3.bf16.msra.mxu1 %v437_v2 }
   0xc   :  { %403 = vmatprep.subr.bf16.mxu0 %v438_v5  ;;  %426 = vmatprep.subr.bf16.mxu1 %v438_v5 }
   0xf   :  { %404 = vmatpush3.bf16.msra.mxu0 %v438_v5  ;;  %431 = vmatpush3.bf16.msra.mxu1 %v438_v5 }
  0x10   :  { %433 = vmatprep.subr.msk.bf16.mxu0 %vm129_vm1, %v439_v6  ;;  %434 = vmatprep.subr.msk.bf16.mxu1 %vm129_vm1, %v439_v6 }
  0x13   :  { %406 = vmatpush3.bf16.msra.mxu0 %v131_v7  ;;  %432 = vmatpush3.bf16.msra.mxu1 %v131_v7 }
  0x16   :  { %408 = vmatmul.mubr.msk.bf16.vlgmr.msra.gmra.mrb[0].mxu0 %vm104_vm0, %v442_v8  ;;  %416 = vmatmul.mubr.msk.bf16.vlgmr.msra.gmra.mrb[0].mxu1 %vm104_vm0, %v443_v9 }
  0x17   :  { %411 = vmatprep.mubr.msk.bf16.mxu0 %vm104_vm0, %v444_v10  ;;  %419 = vmatprep.mubr.msk.bf16.mxu1 %vm104_vm0, %v445_v11 }
  0x1e   :  { %412 = vmatmul.mubr.msk.bf16.gmra.mrb[4].mxu0 %vm104_vm0, %v446_v12  ;;  %420 = vmatmul.mubr.msk.bf16.gmra.mrb[4].mxu1 %vm104_vm0, %v447_v13 }
  0xe9   :  { %v409_v14 = vpop.f32.mrb[0].mxu0  ;;  %v417_v15 = vpop.f32.mrb[0].mxu1 }
  0xea   :  { %448 = vtanh.f32 %v409_v14  ;;  %v167_v16 = vpop.f32.mrb[1].mxu0  ;;  %v199_v17 = vpop.f32.mrb[1].mxu1 }
  0xeb   :  { %450 = vtanh.f32 %v417_v15  ;;  %v410_v18 = vpop.f32.mrb[2].mxu0  ;;  %v418_v19 = vpop.f32.mrb[2].mxu1 }
  0xec   :  { %452 = vtanh.f32 %v167_v16  ;;  %v170_v20 = vpop.f32.mrb[3].mxu0  ;;  %v202_v21 = vpop.f32.mrb[3].mxu1 }
  0xed   :  { %454 = vtanh.f32 %v199_v17 }
  0xee   :  { %456 = vtanh.f32 %v410_v18 }
  0xef   :  { %458 = vtanh.f32 %v418_v19 }
  0xf0   :  { %460 = vtanh.f32 %v170_v20 }
  0xf1   :  { %462 = vtanh.f32 %v202_v21  ;;  %v413_v22 = vpop.f32.mrb[4].mxu0  ;;  %v421_v23 = vpop.f32.mrb[4].mxu1 }
  0xf2   :  { %464 = vtanh.f32 %v413_v22  ;;  %v183_v24 = vpop.f32.mrb[5].mxu0  ;;  %v215_v25 = vpop.f32.mrb[5].mxu1 }
  0xf3   :  { %466 = vtanh.f32 %v421_v23  ;;  %v414_v26 = vpop.f32.mrb[6].mxu0  ;;  %v422_v27 = vpop.f32.mrb[6].mxu1 }
  0xf4   :  { %v449_v28 = vpop.eup %448  ;;  %468 = vtanh.f32 %v183_v24  ;;  %v186_v29 = vpop.f32.mrb[7].mxu0 }
  0xf5   :  { %v218_v30 = vpop.f32.mrb[7].mxu1  ;;  %v451_v31 = vpop.eup %450  ;;  %v370_v32 = vpack.c.bf16 %v449_v28, %v449_v28  ;;  %470 = vtanh.f32 %v215_v25 }
  0xf6   :  { %v453_v33 = vpop.eup %452  ;;  %v378_v34 = vpack.c.bf16 %v451_v31, %v451_v31  ;;  %472 = vtanh.f32 %v414_v26 }
  0xf7   :  { %v455_v35 = vpop.eup %454  ;;  %313 = vst.msk [vmem:[%s608_s2 + $0x8] sm:$0xf] %vm310_vm2, %v370_v32  ;;  %v368_v36 = vpack.c.bf16 %v453_v33, %v453_v33  ;;  %474 = vtanh.f32 %v422_v27 }
  0xf8   :  { %v457_v37 = vpop.eup %456  ;;  %321 = vst.msk [vmem:[%s608_s2 + $0x28] sm:$0xf] %vm310_vm2, %v378_v34  ;;  %v376_v38 = vpack.c.bf16 %v455_v35, %v455_v35  ;;  %476 = vtanh.f32 %v186_v29 }
  0xf9   :  { %v459_v39 = vpop.eup %458  ;;  %311 = vst.msk [vmem:[%s608_s2] sm:$0xf] %vm310_vm2, %v368_v36  ;;  %v371_v40 = vpack.c.bf16 %v457_v37, %v457_v37  ;;  %478 = vtanh.f32 %v218_v30 }
  0xfa   :  { %v461_v41 = vpop.eup %460  ;;  %319 = vst.msk [vmem:[%s608_s2 + $0x20] sm:$0xf] %vm310_vm2, %v376_v38  ;;  %v379_v42 = vpack.c.bf16 %v459_v39, %v459_v39 }
  0xfb   :  { %v463_v43 = vpop.eup %462  ;;  %314 = vst.msk [vmem:[%s608_s2 + $0xc] sm:$0xf] %vm310_vm2, %v371_v40  ;;  %v369_v44 = vpack.c.bf16 %v461_v41, %v461_v41 }
  0xfc   :  { %v465_v45 = vpop.eup %464  ;;  %322 = vst.msk [vmem:[%s608_s2 + $0x2c] sm:$0xf] %vm310_vm2, %v379_v42  ;;  %v377_v46 = vpack.c.bf16 %v463_v43, %v463_v43 }
  0xfd   :  { %v467_v47 = vpop.eup %466  ;;  %312 = vst.msk [vmem:[%s608_s2 + $0x4] sm:$0xf] %vm310_vm2, %v369_v44  ;;  %v374_v48 = vpack.c.bf16 %v465_v45, %v465_v45 }
  0xfe   :  { %v469_v49 = vpop.eup %468  ;;  %320 = vst.msk [vmem:[%s608_s2 + $0x24] sm:$0xf] %vm310_vm2, %v377_v46  ;;  %v382_v50 = vpack.c.bf16 %v467_v47, %v467_v47 }
  0xff   :  { %v471_v51 = vpop.eup %470  ;;  %317 = vst.msk [vmem:[%s608_s2 + $0x18] sm:$0xf] %vm310_vm2, %v374_v48  ;;  %v372_v52 = vpack.c.bf16 %v469_v49, %v469_v49 }
 0x100   :  { %v473_v53 = vpop.eup %472  ;;  %325 = vst.msk [vmem:[%s608_s2 + $0x38] sm:$0xf] %vm310_vm2, %v382_v50  ;;  %v380_v54 = vpack.c.bf16 %v471_v51, %v471_v51 }
 0x101   :  { %v475_v55 = vpop.eup %474  ;;  %315 = vst.msk [vmem:[%s608_s2 + $0x10] sm:$0xf] %vm310_vm2, %v372_v52  ;;  %v375_v56 = vpack.c.bf16 %v473_v53, %v473_v53 }
 0x102   :  { %v477_v57 = vpop.eup %476  ;;  %323 = vst.msk [vmem:[%s608_s2 + $0x30] sm:$0xf] %vm310_vm2, %v380_v54  ;;  %v383_v58 = vpack.c.bf16 %v475_v55, %v475_v55 }
 0x103   :  { %v479_v59 = vpop.eup %478  ;;  %318 = vst.msk [vmem:[%s608_s2 + $0x1c] sm:$0xf] %vm310_vm2, %v375_v56  ;;  %v373_v60 = vpack.c.bf16 %v477_v57, %v477_v57 }
 0x104   :  { %326 = vst.msk [vmem:[%s608_s2 + $0x3c] sm:$0xf] %vm310_vm2, %v383_v58  ;;  %v381_v61 = vpack.c.bf16 %v479_v59, %v479_v59 }
 0x105   :  { %316 = vst.msk [vmem:[%s608_s2 + $0x14] sm:$0xf] %vm310_vm2, %v373_v60 }
 0x106   :  { %324 = vst.msk [vmem:[%s608_s2 + $0x34] sm:$0xf] %vm310_vm2, %v381_v61 }

</bundles_post_ra>
